<compile_context>
chip_gen: v7x
topology: tpu7x:2x2x1
jax: 0.10.0
libtpu: 0.0.40
codegen_flags: <defaults>
</compile_context>

<pallas_src>
import functools

import jax
import jax.numpy as jnp
from jax.experimental import pallas as pl
from jax.experimental.pallas import tpu as pltpu


def _round_up(x, m):
    return (x + m - 1) // m * m


# ----------------------------- Pallas kernel --------------------------------
def _janossy_kernel(x_ref, w1_ref, b1_ref, w2_ref, b2_ref, wo_ref, bo_ref,
                    out_ref):
    dot = functools.partial(jnp.dot, preferred_element_type=jnp.float32)

    x = x_ref[...]

    # Layer 1 (fused fwd + rev orderings in one matmul): lanes [0:H) hold the
    # forward-ordering pre-activations, lanes [H:2H) the reversed ordering.
    y = jnp.maximum(dot(x, w1_ref[...]) + b1_ref[...], 0.0)

    # Layer 2: blockdiag(w2, w2) keeps fwd/rev lane groups independent.
    y = jnp.maximum(dot(y.astype(w2_ref.dtype), w2_ref[...]) + b2_ref[...], 0.0)

    # Output projection with vstack(wo, wo): y_fwd @ wo + y_rev @ wo, i.e. the
    # Janossy add-pool is absorbed into the matmul; bo added once.
    z = dot(y.astype(wo_ref.dtype), wo_ref[...]) + bo_ref[...]
    out_ref[...] = z.astype(out_ref.dtype)


# ------------------------------- wrapper -------------------------------------
def readout_linear_janossy(x_atoms, frag_idx, params, *, tile_m_max=2048,
                           compute_dtype=jnp.float32):
    """Janossy readout for fragment_size=3.

    x_atoms:  (n_atoms, D)  atom node features 'h'
    frag_idx: (n_frag, 3)   atom index at each fragment position
    returns:  (n_frag, 3)   'eq' output

    compute_dtype: jnp.float32 (default, v5e-safe / strict numerics) or
                   jnp.bfloat16 (recommended on v6e/v7x; loosen tolerances).
    """
    _, d = x_atoms.shape
    n = frag_idx.shape[0]
    w1, b1, w2, b2, wo, bo = params
    hidden = w1.shape[1]
    out_dim = wo.shape[1]

    # Graph glue: DGL multi_update_all (copy_src + mean over one edge/position)
    # reduces to gathering each fragment's three atom features; one fancy-index
    # builds the (N, 3*D) Janossy input [h0|h1|h2] directly.
    # TODO(synk): the general DGL heterograph message-passing machinery has no
    # Pallas equivalent; this gather could optionally be moved in-kernel
    # (one-hot matmul / in-kernel take) to fuse the whole readout into one pass.
    x = x_atoms[frag_idx].reshape(n, 3 * d)

    # ---- one-time weight packing (Janossy structure baked into the weights) ----
    w1a, w1b, w1c = w1[:d], w1[d:2 * d], w1[2 * d:]
    w1_big = jnp.concatenate([
        jnp.concatenate([w1a, w1c], axis=1),
        jnp.concatenate([w1b, w1b], axis=1),
        jnp.concatenate([w1c, w1a], axis=1)], axis=0)            # (3D, 2H)
    b1_big = jnp.concatenate([b1, b1], axis=1)                    # (1, 2H)
    zero_h = jnp.zeros((hidden, hidden), w2.dtype)
    w2_big = jnp.concatenate([
        jnp.concatenate([w2, zero_h], axis=1),
        jnp.concatenate([zero_h, w2], axis=1)], axis=0)           # (2H, 2H)
    b2_big = jnp.concatenate([b2, b2], axis=1)                    # (1, 2H)
    wo_big = jnp.concatenate([wo, wo], axis=0)                    # (2H, out_dim)

    cd = compute_dtype
    x = x.astype(cd)
    w1_big, w2_big, wo_big = (w1_big.astype(cd), w2_big.astype(cd),
                              wo_big.astype(cd))
    b1_big = b1_big.astype(jnp.float32)
    b2_big = b2_big.astype(jnp.float32)
    bo = bo.astype(jnp.float32)

    # ---- row tiling: big tiles, but >=2 grid steps for large N (v7x megacore) ----
    n8 = _round_up(n, 8)
    tile_m = min(int(tile_m_max), n8)
    if n8 >= 1024 and pl.cdiv(n8, tile_m) < 2:
        tile_m = _round_up(pl.cdiv(n8, 2), 8)
    grid = (pl.cdiv(n, tile_m),)

    row_spec = pl.BlockSpec((tile_m, 3 * d), lambda i: (i, 0))
    full = lambda shape: pl.BlockSpec(shape, lambda i: (0, 0))

    out = pl.pallas_call(
        _janossy_kernel,
        out_shape=jax.ShapeDtypeStruct((n, out_dim), jnp.float32),
        grid_spec=pltpu.PrefetchScalarGridSpec(
            num_scalar_prefetch=0,
            grid=grid,
            in_specs=[
                row_spec,
                full((3 * d, 2 * hidden)), full((1, 2 * hidden)),
                full((2 * hidden, 2 * hidden)), full((1, 2 * hidden)),
                full((2 * hidden, out_dim)), full((1, out_dim)),
            ],
            out_specs=pl.BlockSpec((tile_m, out_dim), lambda i: (i, 0)),
        ),
        compiler_params=pltpu.CompilerParams(
            dimension_semantics=("parallel",)),
    )(x, w1_big, b1_big, w2_big, b2_big, wo_big, bo)

    return out


# ------------------------------ parameter init ------------------------------
def init_params(key, in_features, hidden, out_dim):
    """Deterministic torch.nn.Linear-style init (uniform +-1/sqrt(fan_in))."""
    def linear(k, fan_in, fan_out):
        kw, kb = jax.random.split(k)
        bound = 1.0 / jnp.sqrt(fan_in)
        w = jax.random.uniform(kw, (fan_in, fan_out), jnp.float32, -bound, bound)
        b = jax.random.uniform(kb, (1, fan_out), jnp.float32, -bound, bound)
        return w, b

    k1, k2, k3 = jax.random.split(key, 3)
    w1, b1 = linear(k1, 3 * in_features, hidden)   # sequential_3: Linear(3*in, H)
    w2, b2 = linear(k2, hidden, hidden)            # sequential_3: Linear(H, H)
    wo, bo = linear(k3, hidden, out_dim)           # f_out_3_to_eq: Linear(H, 3)
    return (w1, b1, w2, b2, wo, bo)


def reference(h0, h1, h2, params):
    w1, b1, w2, b2, wo, bo = params

    def mlp(x):
        y = jnp.maximum(x @ w1 + b1, 0.0)
        return jnp.maximum(y @ w2 + b2, 0.0)

    pooled = mlp(jnp.concatenate([h0, h1, h2], axis=1)) + \
             mlp(jnp.concatenate([h2, h1, h0], axis=1))
    return pooled @ wo + bo


# ----------------------------------- main ------------------------------------
if __name__ == "__main__":
    key = jax.random.PRNGKey(0)
    k_atoms, k_idx, k_params = jax.random.split(key, 3)

    n_atoms = 24          # number of atom nodes
    in_features = 8       # atom feature dim ('h')
    n_frag = 1024         # number of fragment nodes (2 parallel grid steps of 512)
    hidden = 32           # mid_features (last int of config [32,'relu',32,'relu'])
    out_dim = 3           # out_features = {'eq': 3}

    # Atom features ('h') and fragment membership (atom index at each position).
    x_atoms = jax.random.normal(k_atoms, (n_atoms, in_features), jnp.float32)
    frag_idx = jax.random.randint(k_idx, (n_frag, 3), 0, n_atoms)

    params = init_params(k_params, in_features, hidden, out_dim)

    eq = readout_linear_janossy(x_atoms, frag_idx, params)
    eq = jax.block_until_ready(eq)

    # Pure-JAX reference (explicit h0/h1/h2 gather + Janossy MLP/pool/Linear).
    h0 = x_atoms[frag_idx[:, 0]]
    h1 = x_atoms[frag_idx[:, 1]]
    h2 = x_atoms[frag_idx[:, 2]]
    ref = reference(h0, h1, h2, params)

    assert eq.shape == (n_frag, out_dim)
    assert jnp.allclose(eq, ref, atol=5e-5, rtol=5e-5)

    print("KERNEL_OK")
</pallas_src>

<mosaic_0001>
module attributes {stable_mosaic.version = 11 : i64} {
  func.func @_janossy_kernel(%arg0: i32, %arg1: memref<512x24xf32, #tpu.memory_space<vmem>>, %arg2: memref<24x64xf32, #tpu.memory_space<vmem>>, %arg3: memref<1x64xf32, #tpu.memory_space<vmem>>, %arg4: memref<64x64xf32, #tpu.memory_space<vmem>>, %arg5: memref<1x64xf32, #tpu.memory_space<vmem>>, %arg6: memref<64x3xf32, #tpu.memory_space<vmem>>, %arg7: memref<1x3xf32, #tpu.memory_space<vmem>>, %arg8: memref<512x3xf32, #tpu.memory_space<vmem>>) attributes {dimension_semantics = [#tpu.dimension_semantics<parallel>], iteration_bounds = array<i64: 2>, scalar_prefetch = 0 : i64, scratch_operands = 0 : i64, tpu.core_type = #tpu.core_type<tc>, window_params = [{transform_indices = @transform_0, window_bounds = array<i64: 512, 24>}, {pipeline_mode = #tpu.pipeline_mode<synchronous>, transform_indices = @transform_1, window_bounds = array<i64: 24, 64>}, {pipeline_mode = #tpu.pipeline_mode<synchronous>, transform_indices = @transform_2, window_bounds = array<i64: 1, 64>}, {pipeline_mode = #tpu.pipeline_mode<synchronous>, transform_indices = @transform_3, window_bounds = array<i64: 64, 64>}, {pipeline_mode = #tpu.pipeline_mode<synchronous>, transform_indices = @transform_4, window_bounds = array<i64: 1, 64>}, {pipeline_mode = #tpu.pipeline_mode<synchronous>, transform_indices = @transform_5, window_bounds = array<i64: 64, 3>}, {pipeline_mode = #tpu.pipeline_mode<synchronous>, transform_indices = @transform_6, window_bounds = array<i64: 1, 3>}, {transform_indices = @transform_7, window_bounds = array<i64: 512, 3>}]} {
    %c0 = arith.constant 0 : index
    %c0_0 = arith.constant 0 : index
    %0 = vector.load %arg1[%c0, %c0_0] : memref<512x24xf32, #tpu.memory_space<vmem>>, vector<512x24xf32>
    %c0_1 = arith.constant 0 : index
    %c0_2 = arith.constant 0 : index
    %1 = vector.load %arg2[%c0_1, %c0_2] : memref<24x64xf32, #tpu.memory_space<vmem>>, vector<24x64xf32>
    %cst = arith.constant dense<0.000000e+00> : vector<512x64xf32>
    %2 = tpu.matmul %0, %1, %cst {dimension_numbers = #tpu.dot_dimension_numbers<[1], [0], [0], [1], [0, 0, 1, 1], [], []>} : vector<512x24xf32>, vector<24x64xf32>, vector<512x64xf32> -> vector<512x64xf32>
    %c0_3 = arith.constant 0 : index
    %c0_4 = arith.constant 0 : index
    %3 = vector.load %arg3[%c0_3, %c0_4] : memref<1x64xf32, #tpu.memory_space<vmem>>, vector<1x64xf32>
    %4 = vector.broadcast %3 : vector<1x64xf32> to vector<512x64xf32>
    %5 = arith.addf %2, %4 : vector<512x64xf32>
    %cst_5 = arith.constant 0.000000e+00 : f32
    %6 = vector.broadcast %cst_5 : f32 to vector<512x64xf32>
    %7 = arith.maximumf %5, %6 : vector<512x64xf32>
    %c0_6 = arith.constant 0 : index
    %c0_7 = arith.constant 0 : index
    %8 = vector.load %arg4[%c0_6, %c0_7] : memref<64x64xf32, #tpu.memory_space<vmem>>, vector<64x64xf32>
    %cst_8 = arith.constant dense<0.000000e+00> : vector<512x64xf32>
    %9 = tpu.matmul %7, %8, %cst_8 {dimension_numbers = #tpu.dot_dimension_numbers<[1], [0], [0], [1], [0, 0, 1, 1], [], []>} : vector<512x64xf32>, vector<64x64xf32>, vector<512x64xf32> -> vector<512x64xf32>
    %c0_9 = arith.constant 0 : index
    %c0_10 = arith.constant 0 : index
    %10 = vector.load %arg5[%c0_9, %c0_10] : memref<1x64xf32, #tpu.memory_space<vmem>>, vector<1x64xf32>
    %11 = vector.broadcast %10 : vector<1x64xf32> to vector<512x64xf32>
    %12 = arith.addf %9, %11 : vector<512x64xf32>
    %cst_11 = arith.constant 0.000000e+00 : f32
    %13 = vector.broadcast %cst_11 : f32 to vector<512x64xf32>
    %14 = arith.maximumf %12, %13 : vector<512x64xf32>
    %c0_12 = arith.constant 0 : index
    %c0_13 = arith.constant 0 : index
    %15 = vector.load %arg6[%c0_12, %c0_13] : memref<64x3xf32, #tpu.memory_space<vmem>>, vector<64x3xf32>
    %cst_14 = arith.constant dense<0.000000e+00> : vector<512x3xf32>
    %16 = tpu.matmul %14, %15, %cst_14 {dimension_numbers = #tpu.dot_dimension_numbers<[1], [0], [0], [1], [0, 0, 1, 1], [], []>} : vector<512x64xf32>, vector<64x3xf32>, vector<512x3xf32> -> vector<512x3xf32>
    %c0_15 = arith.constant 0 : index
    %c0_16 = arith.constant 0 : index
    %17 = vector.load %arg7[%c0_15, %c0_16] : memref<1x3xf32, #tpu.memory_space<vmem>>, vector<1x3xf32>
    %18 = vector.broadcast %17 : vector<1x3xf32> to vector<512x3xf32>
    %19 = arith.addf %16, %18 : vector<512x3xf32>
    %c0_17 = arith.constant 0 : index
    %c0_18 = arith.constant 0 : index
    %20 = vector.load %arg8[%c0_17, %c0_18] : memref<512x3xf32, #tpu.memory_space<vmem>>, vector<512x3xf32>
    tpu.vector_store %arg8[%c0_17, %c0_18], %19 {strides = array<i32>} : memref<512x3xf32, #tpu.memory_space<vmem>>, vector<512x3xf32>,
    return
  }
  func.func @transform_0(%arg0: i32) -> (i32, i32) {
    %c0_i32 = arith.constant 0 : i32
    %c0_i32_0 = arith.constant 0 : i32
    return %arg0, %c0_i32 : i32, i32
  }
  func.func @transform_1(%arg0: i32) -> (i32, i32) {
    %c0_i32 = arith.constant 0 : i32
    %c0_i32_0 = arith.constant 0 : i32
    %c0_i32_1 = arith.constant 0 : i32
    return %c0_i32, %c0_i32_0 : i32, i32
  }
  func.func @transform_2(%arg0: i32) -> (i32, i32) {
    %c0_i32 = arith.constant 0 : i32
    %c0_i32_0 = arith.constant 0 : i32
    %c0_i32_1 = arith.constant 0 : i32
    return %c0_i32, %c0_i32_0 : i32, i32
  }
  func.func @transform_3(%arg0: i32) -> (i32, i32) {
    %c0_i32 = arith.constant 0 : i32
    %c0_i32_0 = arith.constant 0 : i32
    %c0_i32_1 = arith.constant 0 : i32
    return %c0_i32, %c0_i32_0 : i32, i32
  }
  func.func @transform_4(%arg0: i32) -> (i32, i32) {
    %c0_i32 = arith.constant 0 : i32
    %c0_i32_0 = arith.constant 0 : i32
    %c0_i32_1 = arith.constant 0 : i32
    return %c0_i32, %c0_i32_0 : i32, i32
  }
  func.func @transform_5(%arg0: i32) -> (i32, i32) {
    %c0_i32 = arith.constant 0 : i32
    %c0_i32_0 = arith.constant 0 : i32
    %c0_i32_1 = arith.constant 0 : i32
    return %c0_i32, %c0_i32_0 : i32, i32
  }
  func.func @transform_6(%arg0: i32) -> (i32, i32) {
    %c0_i32 = arith.constant 0 : i32
    %c0_i32_0 = arith.constant 0 : i32
    %c0_i32_1 = arith.constant 0 : i32
    return %c0_i32, %c0_i32_0 : i32, i32
  }
  func.func @transform_7(%arg0: i32) -> (i32, i32) {
    %c0_i32 = arith.constant 0 : i32
    %c0_i32_0 = arith.constant 0 : i32
    return %arg0, %c0_i32 : i32, i32
  }
}

</mosaic_0001>

<bundles_post_ra>
// kernel: tpu_custom_call.1
= control target key start
LH: loop header
LB: loop body
LE: loop exit
PB: predicated region body
PF: predicated region fallthrough
CT: control target
= control target key end

     0   :  { %s3207_s24 = smov 0   ;;  %s3979_s0 = inlined_call_operand.vmem [shape: f32[1024,24], index: 0, kind: input, shape index: {}]   ;;  %s3980_s1 = inlined_call_operand.vmem [shape: f32[24,64], index: 1, kind: input, shape index: {}]   ;;  %s3981_s2 = inlined_call_operand.vmem [shape: f32[1,64], index: 2, kind: input, shape index: {}]   ;;  %s3982_s3 = inlined_call_operand.vmem [shape: f32[64,64], index: 3, kind: input, shape index: {}]   ;;  %s3983_s4 = inlined_call_operand.vmem [shape: f32[1,64], index: 4, kind: input, shape index: {}]   ;;  %s3984_s5 = inlined_call_operand.vmem [shape: f32[64,3], index: 5, kind: input, shape index: {}]   ;;  %s3985_s6 = inlined_call_operand.vmem [shape: f32[1,3], index: 6, kind: input, shape index: {}]   ;;  %s3986_s7 = inlined_call_operand.vmem [shape: f32[1024,3], index: 7, kind: output, shape index: {}]  }
   0x1 LB: > { %s2368_s25 = sadd.s32 4294967295, %s3165_s24   ;;  %p2372_p0 = scmp.ge.s32.totalorder %s3165_s24, 1  ;;  %s3165_s24 = sphi %s3207_s24, %s17_s24  }
   0x2   : > { %p238_p1 = scmp.lt.s32.totalorder %s3165_s24, 3 }
   0x4   : > { %p239_p2 = pnand %p2372_p0, %p238_p1 }
   0x5   : > { %v346_v0 = vld [vmem:[%s3980_s1] sm:$0xff] (!%p239_p2)  ;;  %v347_v1 = vld [vmem:[%s3980_s1 + $0x8] sm:$0xff] (!%p239_p2)  ;;  %s2373_s30 = sshll.u32 (!%p239_p2), %s2368_s25, 6  ;;  %v348_v3 = vld [vmem:[%s3980_s1 + $0x10] sm:$0xff] (!%p239_p2)  ;;  %vm356_vm0 = vcmask (!%p239_p2), 195584   ;;  %vm1013_vm1 = vcmask (!%p239_p2), 523264  }
   0x6   : > { %242 = sbr.rel (%p239_p2) target bundleno = 794 (0x31a), region = 48  ;;  %v3111_v2 = vpack.c.bf16 (!%p239_p2), %v347_v1, %v346_v0  ;;  %p271_p3 = scmp.lt.s32.totalorder (!%p239_p2), %s2373_s30, 127  ;;  %v998_v4 = vld [vmem:[%s3982_s3] sm:$0xff] (!%p239_p2)  ;;  %v999_v5 = vld [vmem:[%s3982_s3 + $0x8] sm:$0xff] (!%p239_p2)  ;;  %v1000_v13 = vld [vmem:[%s3982_s3 + $0x10] sm:$0xff] (!%p239_p2)  ;;  %vm2247_vm2 = vcmask (!%p239_p2), 23552  }
   0x7   : > { %v3115_v6 = vpack.c.bf16 (!%p239_p2), %v999_v5, %v998_v4  ;;  %v1001_v14 = vld [vmem:[%s3982_s3 + $0x18] sm:$0xff] (!%p239_p2)  ;;  %v1002_v18 = vld [vmem:[%s3982_s3 + $0x20] sm:$0xff] (!%p239_p2)  ;;  %v1003_v19 = vld [vmem:[%s3982_s3 + $0x28] sm:$0xff] (!%p239_p2) }
   0x8   : > { %3112 = vmatprep.subr.bf16.mxu0 (!%p239_p2), %v3111_v2  ;;  %3147 = vmatprep.subr.bf16.mxu1 (!%p239_p2), %v3111_v2  ;;  %v3119_v17 = vpack.c.bf16 (!%p239_p2), %v1001_v14, %v1000_v13  ;;  %v3123_v26 = vpack.c.bf16 (!%p239_p2), %v1003_v19, %v1002_v18  ;;  %v1004_v28 = vld [vmem:[%s3982_s3 + $0x30] sm:$0xff] (!%p239_p2)  ;;  %v1005_v29 = vld [vmem:[%s3982_s3 + $0x38] sm:$0xff] (!%p239_p2) }
   0x9   : > { %3114 = vmatpush3.bf16.msra.mxu0 (!%p239_p2), %v3111_v2  ;;  %3149 = vmatpush3.bf16.msra.mxu1 (!%p239_p2), %v3111_v2  ;;  %v3127_v33 = vpack.c.bf16 (!%p239_p2), %v1005_v29, %v1004_v28 }
   0xa   : > { %2789 = vmatprep.subr.mxu0 (!%p239_p2), %v348_v3  ;;  %3148 = vmatprep.subr.mxu1 (!%p239_p2), %v348_v3 }
   0xd   : > { %s3988_s30 = smov (!%p271_p3, %s2373_s30), 127  ;;  %2790 = vmatpush3.msra.mxu0 %v348_v3  ;;  %3150 = vmatpush3.msra.mxu1 %v348_v3 }
   0xe   : > { %s2374_s14 = sshll.u32 %s3988_s30, 3  ;;  %3116 = vmatprep.subr.bf16.mxu1 %v3115_v6 }
   0xf   : > { %s3238_s17 = scalar_lea.vmem %s3979_s0, %s2374_s14  ;;  %s3782_s13 = scalar_lea.vmem %s3986_s7, %s2374_s14 }
  0x10   : > { %v282_v7 = vld [vmem:[%s3238_s17] sm:$0xff]  ;;  %v283_v8 = vld [vmem:[%s3238_s17 + $0x8] sm:$0xff]  ;;  %v284_v9 = vld [vmem:[%s3238_s17 + $0x10] sm:$0xff] }
  0x11   : > { %2791 = vmatprep.mubr.msk.f32.mxu0 %vm356_vm0, %v282_v7  ;;  %v285_v10 = vld [vmem:[%s3238_s17 + $0x18] sm:$0xff]  ;;  %v286_v11 = vld [vmem:[%s3238_s17 + $0x20] sm:$0xff]  ;;  %v287_v12 = vld [vmem:[%s3238_s17 + $0x28] sm:$0xff] }
  0x12   : > { %2792 = vmatmul.mubr.msk.f32.vlgmr.msra.gmra.mrb[0].mxu0 %vm356_vm0, %v283_v8  ;;  %v288_v15 = vld [vmem:[%s3238_s17 + $0x30] sm:$0xff]  ;;  %v314_v16 = vld [vmem:[%s3238_s17 + $0x100] sm:$0xff]  ;;  %v289_v20 = vld [vmem:[%s3238_s17 + $0x38] sm:$0xff] }
  0x13   : > { %2794 = vmatprep.mubr.msk.f32.mxu0 %vm356_vm0, %v284_v9  ;;  %2839 = vmatprep.mubr.msk.f32.mxu1 %vm356_vm0, %v314_v16  ;;  %v315_v21 = vld [vmem:[%s3238_s17 + $0x108] sm:$0xff]  ;;  %v316_v22 = vld [vmem:[%s3238_s17 + $0x110] sm:$0xff]  ;;  %v290_v23 = vld [vmem:[%s3238_s17 + $0x40] sm:$0xff] }
  0x14   : > { %2840 = vmatmul.mubr.msk.f32.vlgmr.msra.gmra.mrb[0].mxu1 %vm356_vm0, %v315_v21  ;;  %v317_v24 = vld [vmem:[%s3238_s17 + $0x118] sm:$0xff]  ;;  %v318_v25 = vld [vmem:[%s3238_s17 + $0x120] sm:$0xff]  ;;  %v291_v27 = vld [vmem:[%s3238_s17 + $0x48] sm:$0xff] }
  0x15   : > { %2842 = vmatprep.mubr.msk.f32.mxu1 %vm356_vm0, %v316_v22  ;;  %3118 = vmatpush3.bf16.msra.mxu1 %v3115_v6  ;;  %v292_v30 = vld [vmem:[%s3238_s17 + $0x50] sm:$0xff]  ;;  %v319_v31 = vld [vmem:[%s3238_s17 + $0x128] sm:$0xff]  ;;  %v293_v34 = vld [vmem:[%s3238_s17 + $0x58] sm:$0xff] }
  0x16   : > { %2795 = vmatmul.mubr.msk.f32.gmra.mrb[2].mxu0 %vm356_vm0, %v285_v10  ;;  %3120 = vmatprep.subr.bf16.mxu1 %v3119_v17  ;;  %v320_v32 = vld [vmem:[%s3238_s17 + $0x130] sm:$0xff]  ;;  %v294_v35 = vld [vmem:[%s3238_s17 + $0x60] sm:$0xff]  ;;  %v321_v36 = vld [vmem:[%s3238_s17 + $0x138] sm:$0xff] }
  0x17   : > { %2797 = vmatprep.mubr.msk.f32.mxu0 %vm356_vm0, %v286_v11  ;;  %v322_v37 = vld [vmem:[%s3238_s17 + $0x140] sm:$0xff]  ;;  %v295_v38 = vld [vmem:[%s3238_s17 + $0x68] sm:$0xff]  ;;  %v296_v39 = vld [vmem:[%s3238_s17 + $0x70] sm:$0xff] }
  0x18   : > { %2843 = vmatmul.mubr.msk.f32.gmra.mrb[2].mxu1 %vm356_vm0, %v317_v24  ;;  %v323_v40 = vld [vmem:[%s3238_s17 + $0x148] sm:$0xff]  ;;  %v324_v41 = vld [vmem:[%s3238_s17 + $0x150] sm:$0xff]  ;;  %v297_v42 = vld [vmem:[%s3238_s17 + $0x78] sm:$0xff] }
  0x19   : > { %2845 = vmatprep.mubr.msk.f32.mxu1 %vm356_vm0, %v318_v25  ;;  %3122 = vmatpush3.bf16.msra.mxu1 %v3119_v17  ;;  %v298_v43 = vld [vmem:[%s3238_s17 + $0x80] sm:$0xff]  ;;  %v325_v44 = vld [vmem:[%s3238_s17 + $0x158] sm:$0xff]  ;;  %v299_v46 = vld [vmem:[%s3238_s17 + $0x88] sm:$0xff] }
  0x1a   : > { %2798 = vmatmul.mubr.msk.f32.gmra.mrb[4].mxu0 %vm356_vm0, %v287_v12  ;;  %3124 = vmatprep.subr.bf16.mxu1 %v3123_v26  ;;  %v326_v45 = vld [vmem:[%s3238_s17 + $0x160] sm:$0xff]  ;;  %v300_v47 = vld [vmem:[%s3238_s17 + $0x90] sm:$0xff]  ;;  %v327_v48 = vld [vmem:[%s3238_s17 + $0x168] sm:$0xff] }
  0x1b   : > { %2800 = vmatprep.mubr.msk.f32.mxu0 %vm356_vm0, %v288_v15  ;;  %v328_v49 = vld [vmem:[%s3238_s17 + $0x170] sm:$0xff]  ;;  %v301_v50 = vld [vmem:[%s3238_s17 + $0x98] sm:$0xff]  ;;  %v302_v51 = vld [vmem:[%s3238_s17 + $0xa0] sm:$0xff] }
  0x1c   : > { %2846 = vmatmul.mubr.msk.f32.gmra.mrb[4].mxu1 %vm356_vm0, %v319_v31  ;;  %v329_v52 = vld [vmem:[%s3238_s17 + $0x178] sm:$0xff]  ;;  %v330_v53 = vld [vmem:[%s3238_s17 + $0x180] sm:$0xff]  ;;  %v303_v54 = vld [vmem:[%s3238_s17 + $0xa8] sm:$0xff] }
  0x1d   : > { %2848 = vmatprep.mubr.msk.f32.mxu1 %vm356_vm0, %v320_v32  ;;  %3126 = vmatpush3.bf16.msra.mxu1 %v3123_v26  ;;  %v304_v55 = vld [vmem:[%s3238_s17 + $0xb0] sm:$0xff]  ;;  %v331_v56 = vld [vmem:[%s3238_s17 + $0x188] sm:$0xff]  ;;  %v305_v58 = vld [vmem:[%s3238_s17 + $0xb8] sm:$0xff] }
  0x1e   : > { %2801 = vmatmul.mubr.msk.f32.gmra.mrb[6].mxu0 %vm356_vm0, %v289_v20  ;;  %3128 = vmatprep.subr.bf16.mxu1 %v3127_v33  ;;  %v332_v57 = vld [vmem:[%s3238_s17 + $0x190] sm:$0xff]  ;;  %v306_v59 = vld [vmem:[%s3238_s17 + $0xc0] sm:$0xff]  ;;  %v333_v60 = vld [vmem:[%s3238_s17 + $0x198] sm:$0xff] }
  0x1f   : > { %2803 = vmatprep.mubr.msk.f32.mxu0 %vm356_vm0, %v290_v23  ;;  %v334_v61 = vld [vmem:[%s3238_s17 + $0x1a0] sm:$0xff]  ;;  %v307_v62 = vld [vmem:[%s3238_s17 + $0xc8] sm:$0xff]  ;;  %v308_v63 = vld [vmem:[%s3238_s17 + $0xd0] sm:$0xff] }
  0x20   : > { %2849 = vmatmul.mubr.msk.f32.gmra.mrb[6].mxu1 %vm356_vm0, %v321_v36  ;;  %v335_v0 = vld [vmem:[%s3238_s17 + $0x1a8] sm:$0xff]  ;;  %v336_v1 = vld [vmem:[%s3238_s17 + $0x1b0] sm:$0xff]  ;;  %v309_v2 = vld [vmem:[%s3238_s17 + $0xd8] sm:$0xff] }
  0x21   : > { %2851 = vmatprep.mubr.msk.f32.mxu1 %vm356_vm0, %v322_v37  ;;  %3130 = vmatpush3.bf16.msra.mxu1 %v3127_v33  ;;  %v310_v3 = vld [vmem:[%s3238_s17 + $0xe0] sm:$0xff]  ;;  %v337_v4 = vld [vmem:[%s3238_s17 + $0x1b8] sm:$0xff]  ;;  %v311_v6 = vld [vmem:[%s3238_s17 + $0xe8] sm:$0xff] }
  0x22   : > { %2804 = vmatmul.mubr.msk.f32.gmra.mrb[8].mxu0 %vm356_vm0, %v291_v27  ;;  %v338_v5 = vld [vmem:[%s3238_s17 + $0x1c0] sm:$0xff]  ;;  %v312_v7 = vld [vmem:[%s3238_s17 + $0xf0] sm:$0xff]  ;;  %v339_v8 = vld [vmem:[%s3238_s17 + $0x1c8] sm:$0xff] }
  0x23   : > { %2806 = vmatprep.mubr.msk.f32.mxu0 %vm356_vm0, %v292_v30  ;;  %v340_v9 = vld [vmem:[%s3238_s17 + $0x1d0] sm:$0xff]  ;;  %v313_v10 = vld [vmem:[%s3238_s17 + $0xf8] sm:$0xff]  ;;  %v342_v12 = vld [vmem:[%s3238_s17 + $0x1e0] sm:$0xff] }
  0x24   : > { %2852 = vmatmul.mubr.msk.f32.gmra.mrb[8].mxu1 %vm356_vm0, %v323_v40  ;;  %v341_v11 = vld [vmem:[%s3238_s17 + $0x1d8] sm:$0xff]  ;;  %v343_v13 = vld [vmem:[%s3238_s17 + $0x1e8] sm:$0xff]  ;;  %v344_v14 = vld [vmem:[%s3238_s17 + $0x1f0] sm:$0xff] }
  0x25   : > { %2854 = vmatprep.mubr.msk.f32.mxu1 %vm356_vm0, %v324_v41  ;;  %v345_v15 = vld [vmem:[%s3238_s17 + $0x1f8] sm:$0xff]  ;;  %v3389_v16 = vld [vmem:[%s3981_s2] ss:$0 sm:$0xff]  ;;  %v1656_v22 = vld [vmem:[%s3984_s5 + $0x8] sm:$0xff] }
  0x26   : > { %2807 = vmatmul.mubr.msk.f32.gmra.mrb[10].mxu0 %vm356_vm0, %v293_v34  ;;  %v1655_v21 = vld [vmem:[%s3984_s5] sm:$0xff]  ;;  %v1657_v23 = vld [vmem:[%s3984_s5 + $0x10] sm:$0xff]  ;;  %v1658_v27 = vld [vmem:[%s3984_s5 + $0x18] sm:$0xff] }
  0x27   : > { %2809 = vmatprep.mubr.msk.f32.mxu0 %vm356_vm0, %v294_v35  ;;  %v3131_v26 = vpack.c.bf16 %v1656_v22, %v1655_v21  ;;  %v3135_v31 = vpack.c.bf16 %v1658_v27, %v1657_v23  ;;  %v1659_v32 = vld [vmem:[%s3984_s5 + $0x20] sm:$0xff]  ;;  %v1660_v33 = vld [vmem:[%s3984_s5 + $0x28] sm:$0xff]  ;;  %v1661_v41 = vld [vmem:[%s3984_s5 + $0x30] sm:$0xff] }
  0x28   : > { %2855 = vmatmul.mubr.msk.f32.gmra.mrb[10].mxu1 %vm356_vm0, %v325_v44  ;;  %v3139_v37 = vpack.c.bf16 %v1660_v33, %v1659_v32 }
  0x29   : > { %2857 = vmatprep.mubr.msk.f32.mxu1 %vm356_vm0, %v326_v45  ;;  %3132 = vmatprep.subr.bf16.mxu0 %v3131_v26 }
  0x2a   : > { %2810 = vmatmul.mubr.msk.f32.gmra.mrb[12].mxu0 %vm356_vm0, %v295_v38 }
  0x2b   : > { %2812 = vmatprep.mubr.msk.f32.mxu0 %vm356_vm0, %v296_v39  ;;  %3134 = vmatpush3.bf16.msra.mxu0 %v3131_v26 }
  0x2c   : > { %2858 = vmatmul.mubr.msk.f32.gmra.mrb[12].mxu1 %vm356_vm0, %v327_v48  ;;  %3136 = vmatprep.subr.bf16.mxu0 %v3135_v31 }
  0x2d   : > { %2860 = vmatprep.mubr.msk.f32.mxu1 %vm356_vm0, %v328_v49 }
  0x2e   : > { %2813 = vmatmul.mubr.msk.f32.gmra.mrb[14].mxu0 %vm356_vm0, %v297_v42  ;;  %v1662_v42 = vld [vmem:[%s3984_s5 + $0x38] sm:$0xff] }
  0x2f   : > { %2815 = vmatprep.mubr.msk.f32.mxu0 %vm356_vm0, %v298_v43  ;;  %3138 = vmatpush3.bf16.msra.mxu0 %v3135_v31  ;;  %v3143_v48 = vpack.c.bf16 %v1662_v42, %v1661_v41 }
  0x30   : > { %2861 = vmatmul.mubr.msk.f32.gmra.mrb[14].mxu1 %vm356_vm0, %v329_v52  ;;  %3140 = vmatprep.subr.bf16.mxu0 %v3139_v37 }
  0x31   : > { %2863 = vmatprep.mubr.msk.f32.mxu1 %vm356_vm0, %v330_v53 }
  0x32   : > { %2816 = vmatmul.mubr.msk.f32.gmra.mrb[16].mxu0 %vm356_vm0, %v299_v46 }
  0x33   : > { %2818 = vmatprep.mubr.msk.f32.mxu0 %vm356_vm0, %v300_v47  ;;  %3142 = vmatpush3.bf16.msra.mxu0 %v3139_v37 }
  0x34   : > { %2864 = vmatmul.mubr.msk.f32.gmra.mrb[16].mxu1 %vm356_vm0, %v331_v56  ;;  %3144 = vmatprep.subr.bf16.mxu0 %v3143_v48 }
  0x35   : > { %2866 = vmatprep.mubr.msk.f32.mxu1 %vm356_vm0, %v332_v57 }
  0x36   : > { %2819 = vmatmul.mubr.msk.f32.gmra.mrb[18].mxu0 %vm356_vm0, %v301_v50 }
  0x37   : > { %2821 = vmatprep.mubr.msk.f32.mxu0 %vm356_vm0, %v302_v51  ;;  %3146 = vmatpush3.bf16.msra.mxu0 %v3143_v48 }
  0x38   : > { %2867 = vmatmul.mubr.msk.f32.gmra.mrb[18].mxu1 %vm356_vm0, %v333_v60 }
  0x39   : > { %2869 = vmatprep.mubr.msk.f32.mxu1 %vm356_vm0, %v334_v61 }
  0x3a   : > { %2822 = vmatmul.mubr.msk.f32.gmra.mrb[20].mxu0 %vm356_vm0, %v303_v54 }
  0x3b   : > { %2824 = vmatprep.mubr.msk.f32.mxu0 %vm356_vm0, %v304_v55 }
  0x3c   : > { %2870 = vmatmul.mubr.msk.f32.gmra.mrb[20].mxu1 %vm356_vm0, %v335_v0 }
  0x3d   : > { %2872 = vmatprep.mubr.msk.f32.mxu1 %vm356_vm0, %v336_v1 }
  0x3e   : > { %2825 = vmatmul.mubr.msk.f32.gmra.mrb[22].mxu0 %vm356_vm0, %v305_v58 }
  0x3f   : > { %2827 = vmatprep.mubr.msk.f32.mxu0 %vm356_vm0, %v306_v59 }
  0x40   : > { %2873 = vmatmul.mubr.msk.f32.gmra.mrb[22].mxu1 %vm356_vm0, %v337_v4 }
  0x41   : > { %2875 = vmatprep.mubr.msk.f32.mxu1 %vm356_vm0, %v338_v5 }
  0x42   : > { %2828 = vmatmul.mubr.msk.f32.gmra.mrb[24].mxu0 %vm356_vm0, %v307_v62 }
  0x43   : > { %2830 = vmatprep.mubr.msk.f32.mxu0 %vm356_vm0, %v308_v63 }
  0x44   : > { %2876 = vmatmul.mubr.msk.f32.gmra.mrb[24].mxu1 %vm356_vm0, %v339_v8 }
  0x45   : > { %2878 = vmatprep.mubr.msk.f32.mxu1 %vm356_vm0, %v340_v9 }
  0x46   : > { %2831 = vmatmul.mubr.msk.f32.gmra.mrb[26].mxu0 %vm356_vm0, %v309_v2 }
  0x47   : > { %2833 = vmatprep.mubr.msk.f32.mxu0 %vm356_vm0, %v310_v3 }
  0x48   : > { %2879 = vmatmul.mubr.msk.f32.gmra.mrb[26].mxu1 %vm356_vm0, %v341_v11 }
  0x49   : > { %2881 = vmatprep.mubr.msk.f32.mxu1 %vm356_vm0, %v342_v12 }
  0x4a   : > { %2834 = vmatmul.mubr.msk.f32.gmra.mrb[28].mxu0 %vm356_vm0, %v311_v6 }
  0x4b   : > { %2836 = vmatprep.mubr.msk.f32.mxu0 %vm356_vm0, %v312_v7 }
  0x4c   : > { %2882 = vmatmul.mubr.msk.f32.gmra.mrb[28].mxu1 %vm356_vm0, %v343_v13 }
  0x4d   : > { %2884 = vmatprep.mubr.msk.f32.mxu1 %vm356_vm0, %v344_v14 }
  0x4e   : > { %2837 = vmatmul.mubr.msk.f32.gmra.mrb[30].mxu0 %vm356_vm0, %v313_v10 }
  0x50   : > { %2885 = vmatmul.mubr.msk.f32.gmra.mrb[30].mxu1 %vm356_vm0, %v345_v15 }
  0xe5   : > { %v2793_v17 = vpop.f32.mrb[0].mxu0 }
  0xe6   : > { %v621_v18 = vadd.f32 %v2793_v17, %v3389_v16  ;;  %v615_v19 = vpop.f32.mrb[1].mxu0 }
  0xe7   : > { %v616_v20 = vadd.f32 %v3389_v16, %v615_v19  ;;  %v3424_v44 = vpop.f32.mrb[0].mxu1 }
  0xe8   : > { %v935_v28 = vmax.f32 %v621_v18, 0.0  ;;  %v3427_v45 = vpop.f32.mrb[1].mxu1 }
  0xe9   : > { %v934_v24 = vmax.f32 %v616_v20, 0.0  ;;  %v2796_v25 = vpop.f32.mrb[2].mxu0 }
  0xea   : > { %v631_v29 = vadd.f32 %v2796_v25, %v3389_v16  ;;  %v625_v30 = vpop.f32.mrb[3].mxu0 }
  0xeb   : > { %v626_v34 = vadd.f32 %v3389_v16, %v625_v30  ;;  %2903 = vmatprep.mubr.msk.f32.mxu1 %vm1013_vm1, %v934_v24  ;;  %v3432_v53 = vpop.f32.mrb[2].mxu1 }
  0xec   : > { %2904 = vmatmul.mubr.msk.f32.vlgmr.msra.gmra.mrb[32].mxu1 %vm1013_vm1, %v935_v28  ;;  %v937_v38 = vmax.f32 %v631_v29, 0.0  ;;  %v3435_v54 = vpop.f32.mrb[3].mxu1 }
  0xed   : > { %v936_v35 = vmax.f32 %v626_v34, 0.0  ;;  %v2799_v36 = vpop.f32.mrb[4].mxu0 }
  0xee   : > { %v641_v39 = vadd.f32 %v2799_v36, %v3389_v16  ;;  %v635_v40 = vpop.f32.mrb[5].mxu0 }
  0xef   : > { %v636_v43 = vadd.f32 %v3389_v16, %v635_v40  ;;  %2906 = vmatprep.mubr.msk.f32.mxu1 %vm1013_vm1, %v936_v35  ;;  %v3440_v61 = vpop.f32.mrb[4].mxu1 }
  0xf0   : > { %2907 = vmatmul.mubr.msk.f32.gmra.mrb[34].mxu1 %vm1013_vm1, %v937_v38  ;;  %v939_v49 = vmax.f32 %v641_v39, 0.0  ;;  %v3443_v62 = vpop.f32.mrb[5].mxu1 }
  0xf1   : > { %v938_v46 = vmax.f32 %v636_v43, 0.0  ;;  %v2802_v47 = vpop.f32.mrb[6].mxu0 }
  0xf2   : > { %v651_v50 = vadd.f32 %v2802_v47, %v3389_v16  ;;  %v645_v51 = vpop.f32.mrb[7].mxu0 }
  0xf3   : > { %v646_v52 = vadd.f32 %v3389_v16, %v645_v51  ;;  %2909 = vmatprep.mubr.msk.f32.mxu1 %vm1013_vm1, %v938_v46  ;;  %v3448_v5 = vpop.f32.mrb[6].mxu1 }
  0xf4   : > { %2910 = vmatmul.mubr.msk.f32.gmra.mrb[36].mxu1 %vm1013_vm1, %v939_v49  ;;  %v941_v57 = vmax.f32 %v651_v50, 0.0  ;;  %v3451_v6 = vpop.f32.mrb[7].mxu1 }
  0xf5   : > { %v940_v55 = vmax.f32 %v646_v52, 0.0  ;;  %v2805_v56 = vpop.f32.mrb[8].mxu0 }
  0xf6   : > { %v661_v58 = vadd.f32 %v2805_v56, %v3389_v16  ;;  %v655_v59 = vpop.f32.mrb[9].mxu0 }
  0xf7   : > { %v656_v60 = vadd.f32 %v3389_v16, %v655_v59  ;;  %2912 = vmatprep.mubr.msk.f32.mxu1 %vm1013_vm1, %v940_v55  ;;  %v3456_v13 = vpop.f32.mrb[8].mxu1 }
  0xf8   : > { %2913 = vmatmul.mubr.msk.f32.gmra.mrb[38].mxu1 %vm1013_vm1, %v941_v57  ;;  %v943_v1 = vmax.f32 %v661_v58, 0.0  ;;  %v3459_v14 = vpop.f32.mrb[9].mxu1 }
  0xf9   : > { %v942_v63 = vmax.f32 %v656_v60, 0.0  ;;  %v2808_v0 = vpop.f32.mrb[10].mxu0 }
  0xfa   : > { %v671_v2 = vadd.f32 %v2808_v0, %v3389_v16  ;;  %v665_v3 = vpop.f32.mrb[11].mxu0 }
  0xfb   : > { %v666_v4 = vadd.f32 %v3389_v16, %v665_v3  ;;  %2915 = vmatprep.mubr.msk.f32.mxu1 %vm1013_vm1, %v942_v63  ;;  %v3464_v22 = vpop.f32.mrb[10].mxu1 }
  0xfc   : > { %2916 = vmatmul.mubr.msk.f32.gmra.mrb[40].mxu1 %vm1013_vm1, %v943_v1  ;;  %v945_v9 = vmax.f32 %v671_v2, 0.0  ;;  %v3467_v23 = vpop.f32.mrb[11].mxu1 }
  0xfd   : > { %v944_v7 = vmax.f32 %v666_v4, 0.0  ;;  %v2811_v8 = vpop.f32.mrb[12].mxu0 }
  0xfe   : > { %v681_v10 = vadd.f32 %v2811_v8, %v3389_v16  ;;  %v675_v11 = vpop.f32.mrb[13].mxu0 }
  0xff   : > { %v676_v12 = vadd.f32 %v3389_v16, %v675_v11  ;;  %2918 = vmatprep.mubr.msk.f32.mxu1 %vm1013_vm1, %v944_v7  ;;  %v3472_v30 = vpop.f32.mrb[12].mxu1 }
 0x100   : > { %2919 = vmatmul.mubr.msk.f32.gmra.mrb[42].mxu1 %vm1013_vm1, %v945_v9  ;;  %v947_v18 = vmax.f32 %v681_v10, 0.0  ;;  %v3475_v31 = vpop.f32.mrb[13].mxu1 }
 0x101   : > { %v946_v15 = vmax.f32 %v676_v12, 0.0  ;;  %v2814_v17 = vpop.f32.mrb[14].mxu0 }
 0x102   : > { %v691_v19 = vadd.f32 %v2814_v17, %v3389_v16  ;;  %v685_v20 = vpop.f32.mrb[15].mxu0 }
 0x103   : > { %v686_v21 = vadd.f32 %v3389_v16, %v685_v20  ;;  %2921 = vmatprep.mubr.msk.f32.mxu1 %vm1013_vm1, %v946_v15  ;;  %v3480_v38 = vpop.f32.mrb[14].mxu1 }
 0x104   : > { %2922 = vmatmul.mubr.msk.f32.gmra.mrb[44].mxu1 %vm1013_vm1, %v947_v18  ;;  %v949_v26 = vmax.f32 %v691_v19, 0.0  ;;  %v3483_v39 = vpop.f32.mrb[15].mxu1 }
 0x105   : > { %v948_v24 = vmax.f32 %v686_v21, 0.0  ;;  %v2817_v25 = vpop.f32.mrb[16].mxu0 }
 0x106   : > { %v701_v27 = vadd.f32 %v2817_v25, %v3389_v16  ;;  %v695_v28 = vpop.f32.mrb[17].mxu0 }
 0x107   : > { %v696_v29 = vadd.f32 %v3389_v16, %v695_v28  ;;  %2924 = vmatprep.mubr.msk.f32.mxu1 %vm1013_vm1, %v948_v24  ;;  %v3488_v48 = vpop.f32.mrb[16].mxu1 }
 0x108   : > { %2925 = vmatmul.mubr.msk.f32.gmra.mrb[46].mxu1 %vm1013_vm1, %v949_v26  ;;  %v951_v34 = vmax.f32 %v701_v27, 0.0  ;;  %v3491_v49 = vpop.f32.mrb[17].mxu1 }
 0x109   : > { %v950_v32 = vmax.f32 %v696_v29, 0.0  ;;  %v2820_v33 = vpop.f32.mrb[18].mxu0 }
 0x10a   : > { %v711_v35 = vadd.f32 %v2820_v33, %v3389_v16  ;;  %v705_v36 = vpop.f32.mrb[19].mxu0  ;;  %v776_v33 = vadd.f32 %v3389_v16, %v3427_v45 }
 0x10b   : > { %v706_v37 = vadd.f32 %v3389_v16, %v705_v36  ;;  %2927 = vmatprep.mubr.msk.f32.mxu1 %vm1013_vm1, %v950_v32  ;;  %v3496_v58 = vpop.f32.mrb[18].mxu1 }
 0x10c   : > { %2928 = vmatmul.mubr.msk.f32.gmra.mrb[48].mxu1 %vm1013_vm1, %v951_v34  ;;  %v953_v42 = vmax.f32 %v711_v35, 0.0  ;;  %v3499_v59 = vpop.f32.mrb[19].mxu1 }
 0x10d   : > { %v952_v40 = vmax.f32 %v706_v37, 0.0  ;;  %v2823_v41 = vpop.f32.mrb[20].mxu0 }
 0x10e   : > { %v721_v43 = vadd.f32 %v2823_v41, %v3389_v16  ;;  %v715_v46 = vpop.f32.mrb[21].mxu0 }
 0x10f   : > { %v716_v47 = vadd.f32 %v3389_v16, %v715_v46  ;;  %2930 = vmatprep.mubr.msk.f32.mxu1 %vm1013_vm1, %v952_v40  ;;  %v3504_v4 = vpop.f32.mrb[20].mxu1  ;;  %v786_v46 = vadd.f32 %v3389_v16, %v3435_v54  ;;  %v791_v54 = vadd.f32 %v3432_v53, %v3389_v16  ;;  %v816_v53 = vadd.f32 %v3389_v16, %v3459_v14 }
 0x110   : > { %2931 = vmatmul.mubr.msk.f32.gmra.mrb[50].mxu1 %vm1013_vm1, %v953_v42  ;;  %v955_v52 = vmax.f32 %v721_v43, 0.0  ;;  %v3507_v7 = vpop.f32.mrb[21].mxu1  ;;  %v966_v43 = vmax.f32 %v776_v33, 0.0 }
 0x111   : > { %v954_v50 = vmax.f32 %v716_v47, 0.0  ;;  %v2826_v51 = vpop.f32.mrb[22].mxu0  ;;  %v781_v47 = vadd.f32 %v3424_v44, %v3389_v16 }
 0x112   : > { %v731_v55 = vadd.f32 %v2826_v51, %v3389_v16  ;;  %v725_v56 = vpop.f32.mrb[23].mxu0 }
 0x113   : > { %v726_v57 = vadd.f32 %v3389_v16, %v725_v56  ;;  %2933 = vmatprep.mubr.msk.f32.mxu1 %vm1013_vm1, %v954_v50  ;;  %v3512_v17 = vpop.f32.mrb[22].mxu1  ;;  %v967_v56 = vmax.f32 %v781_v47, 0.0 }
 0x114   : > { %2934 = vmatmul.mubr.msk.f32.gmra.mrb[52].mxu1 %vm1013_vm1, %v955_v52  ;;  %v957_v0 = vmax.f32 %v731_v55, 0.0  ;;  %v3515_v18 = vpop.f32.mrb[23].mxu1  ;;  %v968_v52 = vmax.f32 %v786_v46, 0.0  ;;  %v796_v55 = vadd.f32 %v3389_v16, %v3443_v62  ;;  %v801_v62 = vadd.f32 %v3440_v61, %v3389_v16 }
 0x115   : > { %v956_v60 = vmax.f32 %v726_v57, 0.0  ;;  %v2829_v63 = vpop.f32.mrb[24].mxu0  ;;  %v826_v61 = vadd.f32 %v3389_v16, %v3467_v23 }
 0x116   : > { %v741_v1 = vadd.f32 %v2829_v63, %v3389_v16  ;;  %v735_v2 = vpop.f32.mrb[25].mxu0  ;;  %v806_v63 = vadd.f32 %v3389_v16, %v3451_v6 }
 0x117   : > { %v736_v3 = vadd.f32 %v3389_v16, %v735_v2  ;;  %2936 = vmatprep.mubr.msk.f32.mxu1 %vm1013_vm1, %v956_v60  ;;  %v3520_v27 = vpop.f32.mrb[24].mxu1  ;;  %v970_v60 = vmax.f32 %v796_v55, 0.0  ;;  %v971_v2 = vmax.f32 %v801_v62, 0.0 }
 0x118   : > { %2937 = vmatmul.mubr.msk.f32.gmra.mrb[54].mxu1 %vm1013_vm1, %v957_v0  ;;  %v959_v10 = vmax.f32 %v741_v1, 0.0  ;;  %v3523_v28 = vpop.f32.mrb[25].mxu1  ;;  %v969_v0 = vmax.f32 %v791_v54, 0.0  ;;  %v972_v1 = vmax.f32 %v806_v63, 0.0 }
 0x119   : > { %v958_v8 = vmax.f32 %v736_v3, 0.0  ;;  %v2832_v9 = vpop.f32.mrb[26].mxu0  ;;  %v811_v3 = vadd.f32 %v3448_v5, %v3389_v16  ;;  %v836_v5 = vadd.f32 %v3389_v16, %v3475_v31 }
 0x11a   : > { %v751_v11 = vadd.f32 %v2832_v9, %v3389_v16  ;;  %v745_v12 = vpop.f32.mrb[27].mxu0  ;;  %v821_v9 = vadd.f32 %v3456_v13, %v3389_v16  ;;  %v846_v13 = vadd.f32 %v3389_v16, %v3483_v39 }
 0x11b   : > { %v746_v15 = vadd.f32 %v3389_v16, %v745_v12  ;;  %2939 = vmatprep.mubr.msk.f32.mxu1 %vm1013_vm1, %v958_v8  ;;  %v3530_v40 = vpop.f32.mrb[26].mxu1  ;;  %v974_v8 = vmax.f32 %v816_v53, 0.0  ;;  %v973_v6 = vmax.f32 %v811_v3, 0.0  ;;  %v978_v12 = vmax.f32 %v836_v5, 0.0 }
 0x11c   : > { %2940 = vmatmul.mubr.msk.f32.gmra.mrb[56].mxu1 %vm1013_vm1, %v959_v10  ;;  %v961_v21 = vmax.f32 %v751_v11, 0.0  ;;  %v3533_v41 = vpop.f32.mrb[27].mxu1  ;;  %v976_v10 = vmax.f32 %v826_v61, 0.0  ;;  %v975_v14 = vmax.f32 %v821_v9, 0.0  ;;  %v831_v11 = vadd.f32 %v3464_v22, %v3389_v16 }
 0x11d   : > { %v960_v19 = vmax.f32 %v746_v15, 0.0  ;;  %v2835_v20 = vpop.f32.mrb[28].mxu0  ;;  %v841_v15 = vadd.f32 %v3472_v30, %v3389_v16  ;;  %v856_v22 = vadd.f32 %v3389_v16, %v3491_v49  ;;  %v866_v30 = vadd.f32 %v3389_v16, %v3499_v59 }
 0x11e   : > { %v761_v24 = vadd.f32 %v2835_v20, %v3389_v16  ;;  %v755_v25 = vpop.f32.mrb[29].mxu0  ;;  %v977_v23 = vmax.f32 %v831_v11, 0.0  ;;  %v851_v20 = vadd.f32 %v3480_v38, %v3389_v16  ;;  %v876_v38 = vadd.f32 %v3389_v16, %v3507_v7 }
 0x11f   : > { %v756_v26 = vadd.f32 %v3389_v16, %v755_v25  ;;  %2942 = vmatprep.mubr.msk.f32.mxu1 %vm1013_vm1, %v960_v19  ;;  %v3540_v50 = vpop.f32.mrb[28].mxu1  ;;  %v980_v19 = vmax.f32 %v846_v13, 0.0  ;;  %v979_v31 = vmax.f32 %v841_v15, 0.0  ;;  %v984_v25 = vmax.f32 %v866_v30, 0.0 }
 0x120   : > { %2943 = vmatmul.mubr.msk.f32.gmra.mrb[58].mxu1 %vm1013_vm1, %v961_v21  ;;  %v963_v34 = vmax.f32 %v761_v24, 0.0  ;;  %v3543_v51 = vpop.f32.mrb[29].mxu1  ;;  %v982_v21 = vmax.f32 %v856_v22, 0.0  ;;  %v981_v39 = vmax.f32 %v851_v20, 0.0  ;;  %v861_v24 = vadd.f32 %v3488_v48, %v3389_v16 }
 0x121   : > { %v962_v29 = vmax.f32 %v756_v26, 0.0  ;;  %v2838_v32 = vpop.f32.mrb[30].mxu0  ;;  %v871_v26 = vadd.f32 %v3496_v58, %v3389_v16  ;;  %v886_v48 = vadd.f32 %v3389_v16, %v3515_v18  ;;  %v896_v58 = vadd.f32 %v3389_v16, %v3523_v28 }
 0x122   : > { %v771_v35 = vadd.f32 %v2838_v32, %v3389_v16  ;;  %v765_v36 = vpop.f32.mrb[31].mxu0  ;;  %v983_v49 = vmax.f32 %v861_v24, 0.0  ;;  %v881_v32 = vadd.f32 %v3504_v4, %v3389_v16  ;;  %v906_v4 = vadd.f32 %v3389_v16, %v3533_v41 }
 0x123   : > { %v766_v37 = vadd.f32 %v3389_v16, %v765_v36  ;;  %2945 = vmatprep.mubr.msk.f32.mxu1 %vm1013_vm1, %v962_v29  ;;  %v3550_v57 = vpop.f32.mrb[30].mxu1  ;;  %v986_v29 = vmax.f32 %v876_v38, 0.0  ;;  %v985_v59 = vmax.f32 %v871_v26, 0.0  ;;  %v988_v33 = vmax.f32 %v886_v48, 0.0 }
 0x124   : > { %2946 = vmatmul.mubr.msk.f32.gmra.mrb[60].mxu1 %vm1013_vm1, %v963_v34  ;;  %v965_v45 = vmax.f32 %v771_v35, 0.0  ;;  %v3553_v44 = vpop.f32.mrb[31].mxu1  ;;  %v987_v7 = vmax.f32 %v881_v32, 0.0  ;;  %v891_v34 = vadd.f32 %v3512_v17, %v3389_v16  ;;  %v990_v35 = vmax.f32 %v896_v58, 0.0 }
 0x125   : > { %v964_v42 = vmax.f32 %v766_v37, 0.0  ;;  %v901_v36 = vadd.f32 %v3520_v27, %v3389_v16  ;;  %v992_v37 = vmax.f32 %v906_v4, 0.0  ;;  %v916_v17 = vadd.f32 %v3389_v16, %v3543_v51 }
 0x126   : > { %v989_v18 = vmax.f32 %v891_v34, 0.0  ;;  %v926_v27 = vadd.f32 %v3389_v16, %v3553_v44  ;;  %v921_v46 = vadd.f32 %v3540_v50, %v3389_v16  ;;  %v3642_v50 = vld [vmem:[%s3983_s4] ss:$0 sm:$0xff] }
 0x127   : > { %2948 = vmatprep.mubr.msk.f32.mxu1 %vm1013_vm1, %v964_v42  ;;  %v991_v28 = vmax.f32 %v901_v36, 0.0  ;;  %v911_v42 = vadd.f32 %v3530_v40, %v3389_v16  ;;  %v931_v40 = vadd.f32 %v3550_v57, %v3389_v16 }
 0x128   : > { %2949 = vmatmul.mubr.msk.f32.gmra.mrb[62].mxu1 %vm1013_vm1, %v965_v45  ;;  %v996_v45 = vmax.f32 %v926_v27, 0.0  ;;  %v995_v47 = vmax.f32 %v921_v46, 0.0 }
 0x129   : > { %2951 = vmatprep.mubr.msk.f32.mxu1 %vm1013_vm1, %v966_v43  ;;  %v994_v43 = vmax.f32 %v916_v17, 0.0  ;;  %v993_v41 = vmax.f32 %v911_v42, 0.0  ;;  %v997_v51 = vmax.f32 %v931_v40, 0.0 }
 0x12c   : > { %2952 = vmatmul.mubr.msk.f32.gmra.mrb[64].mxu1 %vm1013_vm1, %v967_v56 }
 0x12d   : > { %2954 = vmatprep.mubr.msk.f32.mxu1 %vm1013_vm1, %v968_v52 }
 0x130   : > { %2955 = vmatmul.mubr.msk.f32.gmra.mrb[66].mxu1 %vm1013_vm1, %v969_v0 }
 0x131   : > { %2957 = vmatprep.mubr.msk.f32.mxu1 %vm1013_vm1, %v970_v60 }
 0x134   : > { %2958 = vmatmul.mubr.msk.f32.gmra.mrb[68].mxu1 %vm1013_vm1, %v971_v2 }
 0x135   : > { %2960 = vmatprep.mubr.msk.f32.mxu1 %vm1013_vm1, %v972_v1 }
 0x138   : > { %2961 = vmatmul.mubr.msk.f32.gmra.mrb[70].mxu1 %vm1013_vm1, %v973_v6 }
 0x139   : > { %2963 = vmatprep.mubr.msk.f32.mxu1 %vm1013_vm1, %v974_v8 }
 0x13c   : > { %2964 = vmatmul.mubr.msk.f32.gmra.mrb[72].mxu1 %vm1013_vm1, %v975_v14 }
 0x13d   : > { %2966 = vmatprep.mubr.msk.f32.mxu1 %vm1013_vm1, %v976_v10 }
 0x140   : > { %2967 = vmatmul.mubr.msk.f32.gmra.mrb[74].mxu1 %vm1013_vm1, %v977_v23 }
 0x141   : > { %2969 = vmatprep.mubr.msk.f32.mxu1 %vm1013_vm1, %v978_v12 }
 0x144   : > { %2970 = vmatmul.mubr.msk.f32.gmra.mrb[76].mxu1 %vm1013_vm1, %v979_v31 }
 0x145   : > { %2972 = vmatprep.mubr.msk.f32.mxu1 %vm1013_vm1, %v980_v19 }
 0x148   : > { %2973 = vmatmul.mubr.msk.f32.gmra.mrb[78].mxu1 %vm1013_vm1, %v981_v39 }
 0x149   : > { %2975 = vmatprep.mubr.msk.f32.mxu1 %vm1013_vm1, %v982_v21 }
 0x14c   : > { %2976 = vmatmul.mubr.msk.f32.gmra.mrb[80].mxu1 %vm1013_vm1, %v983_v49 }
 0x14d   : > { %2978 = vmatprep.mubr.msk.f32.mxu1 %vm1013_vm1, %v984_v25 }
 0x150   : > { %2979 = vmatmul.mubr.msk.f32.gmra.mrb[82].mxu1 %vm1013_vm1, %v985_v59 }
 0x151   : > { %2981 = vmatprep.mubr.msk.f32.mxu1 %vm1013_vm1, %v986_v29 }
 0x154   : > { %2982 = vmatmul.mubr.msk.f32.gmra.mrb[84].mxu1 %vm1013_vm1, %v987_v7 }
 0x155   : > { %2984 = vmatprep.mubr.msk.f32.mxu1 %vm1013_vm1, %v988_v33 }
 0x158   : > { %2985 = vmatmul.mubr.msk.f32.gmra.mrb[86].mxu1 %vm1013_vm1, %v989_v18 }
 0x159   : > { %2987 = vmatprep.mubr.msk.f32.mxu1 %vm1013_vm1, %v990_v35 }
 0x15c   : > { %2988 = vmatmul.mubr.msk.f32.gmra.mrb[88].mxu1 %vm1013_vm1, %v991_v28 }
 0x15d   : > { %2990 = vmatprep.mubr.msk.f32.mxu1 %vm1013_vm1, %v992_v37 }
 0x160   : > { %2991 = vmatmul.mubr.msk.f32.gmra.mrb[90].mxu1 %vm1013_vm1, %v993_v41 }
 0x161   : > { %2993 = vmatprep.mubr.msk.f32.mxu1 %vm1013_vm1, %v994_v43 }
 0x164   : > { %2994 = vmatmul.mubr.msk.f32.gmra.mrb[92].mxu1 %vm1013_vm1, %v995_v47 }
 0x165   : > { %2996 = vmatprep.mubr.msk.f32.mxu1 %vm1013_vm1, %v996_v45 }
 0x168   : > { %2997 = vmatmul.mubr.msk.f32.gmra.mrb[94].mxu1 %vm1013_vm1, %v997_v51 }
 0x1bf   : > { %v2905_v52 = vpop.f32.mrb[32].mxu1 }
 0x1c0   : > { %v1278_v55 = vadd.f32 %v2905_v52, %v3642_v50  ;;  %v1272_v56 = vpop.f32.mrb[33].mxu1 }
 0x1c1   : > { %v1273_v54 = vadd.f32 %v3642_v50, %v1272_v56 }
 0x1c2   : > { %v1592_v57 = vmax.f32 %v1278_v55, 0.0 }
 0x1c3   : > { %v1591_v44 = vmax.f32 %v1273_v54, 0.0  ;;  %v2908_v16 = vpop.f32.mrb[34].mxu1 }
 0x1c4   : > { %v1288_v60 = vadd.f32 %v2908_v16, %v3642_v50  ;;  %v1282_v63 = vpop.f32.mrb[35].mxu1 }
 0x1c5   : > { %v1283_v0 = vadd.f32 %v3642_v50, %v1282_v63  ;;  %3015 = vmatprep.mubr.msk.f32.mxu0 %vm1013_vm1, %v1591_v44 }
 0x1c6   : > { %3016 = vmatmul.mubr.msk.f32.vlgmr.msra.gmra.mrb[32].mxu0 %vm1013_vm1, %v1592_v57  ;;  %v1594_v53 = vmax.f32 %v1288_v60, 0.0 }
 0x1c7   : > { %v1593_v62 = vmax.f32 %v1283_v0, 0.0  ;;  %v2911_v1 = vpop.f32.mrb[36].mxu1 }
 0x1c8   : > { %v1298_v2 = vadd.f32 %v2911_v1, %v3642_v50  ;;  %v1292_v3 = vpop.f32.mrb[37].mxu1 }
 0x1c9   : > { %v1293_v8 = vadd.f32 %v3642_v50, %v1292_v3  ;;  %3018 = vmatprep.mubr.msk.f32.mxu0 %vm1013_vm1, %v1593_v62 }
 0x1ca   : > { %3019 = vmatmul.mubr.msk.f32.gmra.mrb[34].mxu0 %vm1013_vm1, %v1594_v53  ;;  %v1596_v9 = vmax.f32 %v1298_v2, 0.0 }
 0x1cb   : > { %v1595_v61 = vmax.f32 %v1293_v8, 0.0  ;;  %v2914_v6 = vpop.f32.mrb[38].mxu1 }
 0x1cc   : > { %v1308_v10 = vadd.f32 %v2914_v6, %v3642_v50  ;;  %v1302_v5 = vpop.f32.mrb[39].mxu1 }
 0x1cd   : > { %v1303_v14 = vadd.f32 %v3642_v50, %v1302_v5  ;;  %3021 = vmatprep.mubr.msk.f32.mxu0 %vm1013_vm1, %v1595_v61 }
 0x1ce   : > { %3022 = vmatmul.mubr.msk.f32.gmra.mrb[36].mxu0 %vm1013_vm1, %v1596_v9  ;;  %v1598_v13 = vmax.f32 %v1308_v10, 0.0 }
 0x1cf   : > { %v1597_v11 = vmax.f32 %v1303_v14, 0.0  ;;  %v2917_v12 = vpop.f32.mrb[40].mxu1 }
 0x1d0   : > { %v1318_v23 = vadd.f32 %v2917_v12, %v3642_v50  ;;  %v1312_v15 = vpop.f32.mrb[41].mxu1 }
 0x1d1   : > { %v1313_v19 = vadd.f32 %v3642_v50, %v1312_v15  ;;  %3024 = vmatprep.mubr.msk.f32.mxu0 %vm1013_vm1, %v1597_v11 }
 0x1d2   : > { %3025 = vmatmul.mubr.msk.f32.gmra.mrb[38].mxu0 %vm1013_vm1, %v1598_v13  ;;  %v1600_v20 = vmax.f32 %v1318_v23, 0.0 }
 0x1d3   : > { %v1599_v22 = vmax.f32 %v1313_v19, 0.0  ;;  %v2920_v31 = vpop.f32.mrb[42].mxu1 }
 0x1d4   : > { %v1328_v21 = vadd.f32 %v2920_v31, %v3642_v50  ;;  %v1322_v30 = vpop.f32.mrb[43].mxu1 }
 0x1d5   : > { %v1323_v39 = vadd.f32 %v3642_v50, %v1322_v30  ;;  %3027 = vmatprep.mubr.msk.f32.mxu0 %vm1013_vm1, %v1599_v22 }
 0x1d6   : > { %3028 = vmatmul.mubr.msk.f32.gmra.mrb[40].mxu0 %vm1013_vm1, %v1600_v20  ;;  %v1602_v38 = vmax.f32 %v1328_v21, 0.0 }
 0x1d7   : > { %v1601_v24 = vmax.f32 %v1323_v39, 0.0  ;;  %v2923_v25 = vpop.f32.mrb[44].mxu1 }
 0x1d8   : > { %v1338_v49 = vadd.f32 %v2923_v25, %v3642_v50  ;;  %v1332_v26 = vpop.f32.mrb[45].mxu1 }
 0x1d9   : > { %v1333_v29 = vadd.f32 %v3642_v50, %v1332_v26  ;;  %3030 = vmatprep.mubr.msk.f32.mxu0 %vm1013_vm1, %v1601_v24 }
 0x1da   : > { %3031 = vmatmul.mubr.msk.f32.gmra.mrb[42].mxu0 %vm1013_vm1, %v1602_v38  ;;  %v1604_v32 = vmax.f32 %v1338_v49, 0.0 }
 0x1db   : > { %v1603_v48 = vmax.f32 %v1333_v29, 0.0  ;;  %v2926_v59 = vpop.f32.mrb[46].mxu1 }
 0x1dc   : > { %v1348_v33 = vadd.f32 %v2926_v59, %v3642_v50  ;;  %v1342_v58 = vpop.f32.mrb[47].mxu1 }
 0x1dd   : > { %v1343_v7 = vadd.f32 %v3642_v50, %v1342_v58  ;;  %3033 = vmatprep.mubr.msk.f32.mxu0 %vm1013_vm1, %v1603_v48 }
 0x1de   : > { %3034 = vmatmul.mubr.msk.f32.gmra.mrb[44].mxu0 %vm1013_vm1, %v1604_v32  ;;  %v1606_v4 = vmax.f32 %v1348_v33, 0.0 }
 0x1df   : > { %v1605_v34 = vmax.f32 %v1343_v7, 0.0  ;;  %v2929_v35 = vpop.f32.mrb[48].mxu1 }
 0x1e0   : > { %v1358_v18 = vadd.f32 %v2929_v35, %v3642_v50  ;;  %v1352_v36 = vpop.f32.mrb[49].mxu1 }
 0x1e1   : > { %v1353_v37 = vadd.f32 %v3642_v50, %v1352_v36  ;;  %3036 = vmatprep.mubr.msk.f32.mxu0 %vm1013_vm1, %v1605_v34 }
 0x1e2   : > { %3037 = vmatmul.mubr.msk.f32.gmra.mrb[46].mxu0 %vm1013_vm1, %v1606_v4  ;;  %v1608_v42 = vmax.f32 %v1358_v18, 0.0 }
 0x1e3   : > { %v1607_v17 = vmax.f32 %v1353_v37, 0.0  ;;  %v2932_v28 = vpop.f32.mrb[50].mxu1 }
 0x1e4   : > { %v1368_v43 = vadd.f32 %v2932_v28, %v3642_v50  ;;  %v1362_v27 = vpop.f32.mrb[51].mxu1 }
 0x1e5   : > { %v1363_v41 = vadd.f32 %v3642_v50, %v1362_v27  ;;  %3039 = vmatprep.mubr.msk.f32.mxu0 %vm1013_vm1, %v1607_v17 }
 0x1e6   : > { %3040 = vmatmul.mubr.msk.f32.gmra.mrb[48].mxu0 %vm1013_vm1, %v1608_v42  ;;  %v1610_v47 = vmax.f32 %v1368_v43, 0.0 }
 0x1e7   : > { %v1609_v46 = vmax.f32 %v1363_v41, 0.0  ;;  %v2935_v45 = vpop.f32.mrb[52].mxu1 }
 0x1e8   : > { %v1378_v40 = vadd.f32 %v2935_v45, %v3642_v50  ;;  %v1372_v51 = vpop.f32.mrb[53].mxu1 }
 0x1e9   : > { %v1373_v52 = vadd.f32 %v3642_v50, %v1372_v51  ;;  %3042 = vmatprep.mubr.msk.f32.mxu0 %vm1013_vm1, %v1609_v46 }
 0x1ea   : > { %3043 = vmatmul.mubr.msk.f32.gmra.mrb[50].mxu0 %vm1013_vm1, %v1610_v47  ;;  %v1612_v54 = vmax.f32 %v1378_v40, 0.0 }
 0x1eb   : > { %v1611_v55 = vmax.f32 %v1373_v52, 0.0  ;;  %v2938_v56 = vpop.f32.mrb[54].mxu1 }
 0x1ec   : > { %v1388_v44 = vadd.f32 %v2938_v56, %v3642_v50  ;;  %v1382_v16 = vpop.f32.mrb[55].mxu1 }
 0x1ed   : > { %v1383_v57 = vadd.f32 %v3642_v50, %v1382_v16  ;;  %3045 = vmatprep.mubr.msk.f32.mxu0 %vm1013_vm1, %v1611_v55 }
 0x1ee   : > { %3046 = vmatmul.mubr.msk.f32.gmra.mrb[52].mxu0 %vm1013_vm1, %v1612_v54  ;;  %v1614_v0 = vmax.f32 %v1388_v44, 0.0 }
 0x1ef   : > { %v1613_v60 = vmax.f32 %v1383_v57, 0.0  ;;  %v2941_v63 = vpop.f32.mrb[56].mxu1 }
 0x1f0   : > { %v1398_v62 = vadd.f32 %v2941_v63, %v3642_v50  ;;  %v1392_v1 = vpop.f32.mrb[57].mxu1 }
 0x1f1   : > { %v1393_v53 = vadd.f32 %v3642_v50, %v1392_v1  ;;  %3048 = vmatprep.mubr.msk.f32.mxu0 %vm1013_vm1, %v1613_v60 }
 0x1f2   : > { %3049 = vmatmul.mubr.msk.f32.gmra.mrb[54].mxu0 %vm1013_vm1, %v1614_v0  ;;  %v1616_v8 = vmax.f32 %v1398_v62, 0.0 }
 0x1f3   : > { %v1615_v2 = vmax.f32 %v1393_v53, 0.0  ;;  %v2944_v3 = vpop.f32.mrb[58].mxu1 }
 0x1f4   : > { %v1408_v61 = vadd.f32 %v2944_v3, %v3642_v50  ;;  %v1402_v6 = vpop.f32.mrb[59].mxu1 }
 0x1f5   : > { %v1403_v9 = vadd.f32 %v3642_v50, %v1402_v6  ;;  %3051 = vmatprep.mubr.msk.f32.mxu0 %vm1013_vm1, %v1615_v2 }
 0x1f6   : > { %3052 = vmatmul.mubr.msk.f32.gmra.mrb[56].mxu0 %vm1013_vm1, %v1616_v8  ;;  %v1618_v14 = vmax.f32 %v1408_v61, 0.0 }
 0x1f7   : > { %v1617_v10 = vmax.f32 %v1403_v9, 0.0  ;;  %v2947_v5 = vpop.f32.mrb[60].mxu1 }
 0x1f8   : > { %v1418_v11 = vadd.f32 %v2947_v5, %v3642_v50  ;;  %v1412_v12 = vpop.f32.mrb[61].mxu1 }
 0x1f9   : > { %v1413_v13 = vadd.f32 %v3642_v50, %v1412_v12  ;;  %3054 = vmatprep.mubr.msk.f32.mxu0 %vm1013_vm1, %v1617_v10 }
 0x1fa   : > { %3055 = vmatmul.mubr.msk.f32.gmra.mrb[58].mxu0 %vm1013_vm1, %v1618_v14  ;;  %v1620_v19 = vmax.f32 %v1418_v11, 0.0 }
 0x1fb   : > { %v1619_v23 = vmax.f32 %v1413_v13, 0.0  ;;  %v2950_v15 = vpop.f32.mrb[62].mxu1 }
 0x1fc   : > { %v1428_v22 = vadd.f32 %v2950_v15, %v3642_v50  ;;  %v1422_v31 = vpop.f32.mrb[63].mxu1 }
 0x1fd   : > { %v1423_v20 = vadd.f32 %v3642_v50, %v1422_v31  ;;  %3057 = vmatprep.mubr.msk.f32.mxu0 %vm1013_vm1, %v1619_v23 }
 0x1fe   : > { %3058 = vmatmul.mubr.msk.f32.gmra.mrb[60].mxu0 %vm1013_vm1, %v1620_v19  ;;  %v1622_v39 = vmax.f32 %v1428_v22, 0.0 }
 0x1ff   : > { %v1621_v21 = vmax.f32 %v1423_v20, 0.0  ;;  %v2953_v30 = vpop.f32.mrb[64].mxu1 }
 0x200   : > { %v1438_v24 = vadd.f32 %v2953_v30, %v3642_v50  ;;  %v1432_v25 = vpop.f32.mrb[65].mxu1 }
 0x201   : > { %v1433_v38 = vadd.f32 %v3642_v50, %v1432_v25  ;;  %3060 = vmatprep.mubr.msk.f32.mxu0 %vm1013_vm1, %v1621_v21 }
 0x202   : > { %3061 = vmatmul.mubr.msk.f32.gmra.mrb[62].mxu0 %vm1013_vm1, %v1622_v39  ;;  %v1624_v29 = vmax.f32 %v1438_v24, 0.0 }
 0x203   : > { %v1623_v49 = vmax.f32 %v1433_v38, 0.0  ;;  %v2956_v26 = vpop.f32.mrb[66].mxu1 }
 0x204   : > { %v1448_v48 = vadd.f32 %v2956_v26, %v3642_v50  ;;  %v1442_v59 = vpop.f32.mrb[67].mxu1 }
 0x205   : > { %v1443_v32 = vadd.f32 %v3642_v50, %v1442_v59  ;;  %3063 = vmatprep.mubr.msk.f32.mxu0 %vm1013_vm1, %v1623_v49 }
 0x206   : > { %3064 = vmatmul.mubr.msk.f32.gmra.mrb[64].mxu0 %vm1013_vm1, %v1624_v29  ;;  %v1626_v7 = vmax.f32 %v1448_v48, 0.0 }
 0x207   : > { %v1625_v33 = vmax.f32 %v1443_v32, 0.0  ;;  %v2959_v58 = vpop.f32.mrb[68].mxu1 }
 0x208   : > { %v1458_v34 = vadd.f32 %v2959_v58, %v3642_v50  ;;  %v1452_v35 = vpop.f32.mrb[69].mxu1 }
 0x209   : > { %v1453_v4 = vadd.f32 %v3642_v50, %v1452_v35  ;;  %3066 = vmatprep.mubr.msk.f32.mxu0 %vm1013_vm1, %v1625_v33 }
 0x20a   : > { %3067 = vmatmul.mubr.msk.f32.gmra.mrb[66].mxu0 %vm1013_vm1, %v1626_v7  ;;  %v1628_v37 = vmax.f32 %v1458_v34, 0.0 }
 0x20b   : > { %v1627_v18 = vmax.f32 %v1453_v4, 0.0  ;;  %v2962_v36 = vpop.f32.mrb[70].mxu1 }
 0x20c   : > { %v1468_v17 = vadd.f32 %v2962_v36, %v3642_v50  ;;  %v1462_v28 = vpop.f32.mrb[71].mxu1 }
 0x20d   : > { %v1463_v42 = vadd.f32 %v3642_v50, %v1462_v28  ;;  %3069 = vmatprep.mubr.msk.f32.mxu0 %vm1013_vm1, %v1627_v18 }
 0x20e   : > { %3070 = vmatmul.mubr.msk.f32.gmra.mrb[68].mxu0 %vm1013_vm1, %v1628_v37  ;;  %v1630_v41 = vmax.f32 %v1468_v17, 0.0 }
 0x20f   : > { %v1629_v43 = vmax.f32 %v1463_v42, 0.0  ;;  %v2965_v27 = vpop.f32.mrb[72].mxu1 }
 0x210   : > { %v1478_v46 = vadd.f32 %v2965_v27, %v3642_v50  ;;  %v1472_v45 = vpop.f32.mrb[73].mxu1 }
 0x211   : > { %v1473_v47 = vadd.f32 %v3642_v50, %v1472_v45  ;;  %3072 = vmatprep.mubr.msk.f32.mxu0 %vm1013_vm1, %v1629_v43 }
 0x212   : > { %3073 = vmatmul.mubr.msk.f32.gmra.mrb[70].mxu0 %vm1013_vm1, %v1630_v41  ;;  %v1632_v52 = vmax.f32 %v1478_v46, 0.0 }
 0x213   : > { %v1631_v40 = vmax.f32 %v1473_v47, 0.0  ;;  %v2968_v51 = vpop.f32.mrb[74].mxu1 }
 0x214   : > { %v1488_v55 = vadd.f32 %v2968_v51, %v3642_v50  ;;  %v1482_v56 = vpop.f32.mrb[75].mxu1 }
 0x215   : > { %v1483_v54 = vadd.f32 %v3642_v50, %v1482_v56  ;;  %3075 = vmatprep.mubr.msk.f32.mxu0 %vm1013_vm1, %v1631_v40 }
 0x216   : > { %3076 = vmatmul.mubr.msk.f32.gmra.mrb[72].mxu0 %vm1013_vm1, %v1632_v52  ;;  %v1634_v57 = vmax.f32 %v1488_v55, 0.0 }
 0x217   : > { %v1633_v44 = vmax.f32 %v1483_v54, 0.0  ;;  %v2971_v16 = vpop.f32.mrb[76].mxu1  ;;  %v3775_v54 = vld [vmem:[%s3985_s6] ss:$0 sm:$0xff] }
 0x218   : > { %v1498_v60 = vadd.f32 %v2971_v16, %v3642_v50  ;;  %v1492_v63 = vpop.f32.mrb[77].mxu1 }
 0x219   : > { %v1493_v0 = vadd.f32 %v3642_v50, %v1492_v63  ;;  %3078 = vmatprep.mubr.msk.f32.mxu0 %vm1013_vm1, %v1633_v44 }
 0x21a   : > { %3079 = vmatmul.mubr.msk.f32.gmra.mrb[74].mxu0 %vm1013_vm1, %v1634_v57  ;;  %v1636_v53 = vmax.f32 %v1498_v60, 0.0 }
 0x21b   : > { %v1635_v62 = vmax.f32 %v1493_v0, 0.0  ;;  %v2974_v1 = vpop.f32.mrb[78].mxu1 }
 0x21c   : > { %v1508_v2 = vadd.f32 %v2974_v1, %v3642_v50  ;;  %v1502_v3 = vpop.f32.mrb[79].mxu1 }
 0x21d   : > { %v1503_v8 = vadd.f32 %v3642_v50, %v1502_v3  ;;  %3081 = vmatprep.mubr.msk.f32.mxu0 %vm1013_vm1, %v1635_v62 }
 0x21e   : > { %3082 = vmatmul.mubr.msk.f32.gmra.mrb[76].mxu0 %vm1013_vm1, %v1636_v53  ;;  %v1638_v9 = vmax.f32 %v1508_v2, 0.0 }
 0x21f   : > { %v1637_v61 = vmax.f32 %v1503_v8, 0.0  ;;  %v2977_v6 = vpop.f32.mrb[80].mxu1 }
 0x220   : > { %v1518_v10 = vadd.f32 %v2977_v6, %v3642_v50  ;;  %v1512_v5 = vpop.f32.mrb[81].mxu1 }
 0x221   : > { %v1513_v14 = vadd.f32 %v3642_v50, %v1512_v5  ;;  %3084 = vmatprep.mubr.msk.f32.mxu0 %vm1013_vm1, %v1637_v61 }
 0x222   : > { %3085 = vmatmul.mubr.msk.f32.gmra.mrb[78].mxu0 %vm1013_vm1, %v1638_v9  ;;  %v1640_v13 = vmax.f32 %v1518_v10, 0.0 }
 0x223   : > { %v1639_v11 = vmax.f32 %v1513_v14, 0.0  ;;  %v2980_v12 = vpop.f32.mrb[82].mxu1 }
 0x224   : > { %v1528_v23 = vadd.f32 %v2980_v12, %v3642_v50  ;;  %v1522_v15 = vpop.f32.mrb[83].mxu1 }
 0x225   : > { %v1523_v19 = vadd.f32 %v3642_v50, %v1522_v15  ;;  %3087 = vmatprep.mubr.msk.f32.mxu0 %vm1013_vm1, %v1639_v11 }
 0x226   : > { %3088 = vmatmul.mubr.msk.f32.gmra.mrb[80].mxu0 %vm1013_vm1, %v1640_v13  ;;  %v1642_v20 = vmax.f32 %v1528_v23, 0.0 }
 0x227   : > { %v1641_v22 = vmax.f32 %v1523_v19, 0.0  ;;  %v2983_v31 = vpop.f32.mrb[84].mxu1 }
 0x228   : > { %v1538_v21 = vadd.f32 %v2983_v31, %v3642_v50  ;;  %v1532_v30 = vpop.f32.mrb[85].mxu1 }
 0x229   : > { %v1533_v39 = vadd.f32 %v3642_v50, %v1532_v30  ;;  %3090 = vmatprep.mubr.msk.f32.mxu0 %vm1013_vm1, %v1641_v22 }
 0x22a   : > { %3091 = vmatmul.mubr.msk.f32.gmra.mrb[82].mxu0 %vm1013_vm1, %v1642_v20  ;;  %v1644_v38 = vmax.f32 %v1538_v21, 0.0 }
 0x22b   : > { %v1643_v24 = vmax.f32 %v1533_v39, 0.0  ;;  %v2986_v25 = vpop.f32.mrb[86].mxu1 }
 0x22c   : > { %v1548_v49 = vadd.f32 %v2986_v25, %v3642_v50  ;;  %v1542_v26 = vpop.f32.mrb[87].mxu1 }
 0x22d   : > { %v1543_v29 = vadd.f32 %v3642_v50, %v1542_v26  ;;  %3093 = vmatprep.mubr.msk.f32.mxu0 %vm1013_vm1, %v1643_v24 }
 0x22e   : > { %3094 = vmatmul.mubr.msk.f32.gmra.mrb[84].mxu0 %vm1013_vm1, %v1644_v38  ;;  %v1646_v32 = vmax.f32 %v1548_v49, 0.0 }
 0x22f   : > { %v1645_v48 = vmax.f32 %v1543_v29, 0.0  ;;  %v2989_v59 = vpop.f32.mrb[88].mxu1 }
 0x230   : > { %v1558_v33 = vadd.f32 %v2989_v59, %v3642_v50  ;;  %v1552_v58 = vpop.f32.mrb[89].mxu1 }
 0x231   : > { %v1553_v7 = vadd.f32 %v3642_v50, %v1552_v58  ;;  %3096 = vmatprep.mubr.msk.f32.mxu0 %vm1013_vm1, %v1645_v48 }
 0x232   : > { %3097 = vmatmul.mubr.msk.f32.gmra.mrb[86].mxu0 %vm1013_vm1, %v1646_v32  ;;  %v1648_v4 = vmax.f32 %v1558_v33, 0.0 }
 0x233   : > { %v1647_v34 = vmax.f32 %v1553_v7, 0.0  ;;  %v2992_v35 = vpop.f32.mrb[90].mxu1 }
 0x234   : > { %v1568_v18 = vadd.f32 %v2992_v35, %v3642_v50  ;;  %v1562_v36 = vpop.f32.mrb[91].mxu1 }
 0x235   : > { %v1563_v37 = vadd.f32 %v3642_v50, %v1562_v36  ;;  %3099 = vmatprep.mubr.msk.f32.mxu0 %vm1013_vm1, %v1647_v34 }
 0x236   : > { %3100 = vmatmul.mubr.msk.f32.gmra.mrb[88].mxu0 %vm1013_vm1, %v1648_v4  ;;  %v1650_v42 = vmax.f32 %v1568_v18, 0.0 }
 0x237   : > { %v1649_v17 = vmax.f32 %v1563_v37, 0.0  ;;  %v2995_v28 = vpop.f32.mrb[92].mxu1 }
 0x238   : > { %v1578_v43 = vadd.f32 %v2995_v28, %v3642_v50  ;;  %v1572_v27 = vpop.f32.mrb[93].mxu1 }
 0x239   : > { %v1573_v41 = vadd.f32 %v3642_v50, %v1572_v27  ;;  %3102 = vmatprep.mubr.msk.f32.mxu0 %vm1013_vm1, %v1649_v17 }
 0x23a   : > { %3103 = vmatmul.mubr.msk.f32.gmra.mrb[90].mxu0 %vm1013_vm1, %v1650_v42  ;;  %v1652_v47 = vmax.f32 %v1578_v43, 0.0 }
 0x23b   : > { %v1651_v46 = vmax.f32 %v1573_v41, 0.0  ;;  %v2998_v45 = vpop.f32.mrb[94].mxu1 }
 0x23c   : > { %v1588_v40 = vadd.f32 %v2998_v45, %v3642_v50  ;;  %v1582_v51 = vpop.f32.mrb[95].mxu1 }
 0x23d   : > { %v1583_v52 = vadd.f32 %v3642_v50, %v1582_v51  ;;  %3105 = vmatprep.mubr.msk.f32.mxu0 %vm1013_vm1, %v1651_v46 }
 0x23e   : > { %3106 = vmatmul.mubr.msk.f32.gmra.mrb[92].mxu0 %vm1013_vm1, %v1652_v47  ;;  %v1654_v56 = vmax.f32 %v1588_v40, 0.0 }
 0x23f   : > { %v1653_v55 = vmax.f32 %v1583_v52, 0.0 }
 0x241   : > { %3108 = vmatprep.mubr.msk.f32.mxu0 %vm1013_vm1, %v1653_v55 }
 0x242   : > { %3109 = vmatmul.mubr.msk.f32.gmra.mrb[94].mxu0 %vm1013_vm1, %v1654_v56 }
 0x299   : > { %v3017_v50 = vpop.f32.mrb[32].mxu0 }
 0x29a   : > { %v1934_v44 = vadd.f32 %v3017_v50, %v3775_v54  ;;  %v1928_v16 = vpop.f32.mrb[33].mxu0 }
 0x29b   : > { %v1929_v57 = vadd.f32 %v3775_v54, %v1928_v16 }
 0x29c   : > { %2249 = vst.msk [vmem:[%s3782_s13 + $0x8] sm:$0xff] %vm2247_vm2, %v1934_v44 }
 0x29d   : > { %2248 = vst.msk [vmem:[%s3782_s13] sm:$0xff] %vm2247_vm2, %v1929_v57  ;;  %v3020_v60 = vpop.f32.mrb[34].mxu0 }
 0x29e   : > { %v1944_v63 = vadd.f32 %v3020_v60, %v3775_v54  ;;  %v1938_v0 = vpop.f32.mrb[35].mxu0 }
 0x29f   : > { %v1939_v62 = vadd.f32 %v3775_v54, %v1938_v0 }
 0x2a0   : > { %2251 = vst.msk [vmem:[%s3782_s13 + $0x18] sm:$0xff] %vm2247_vm2, %v1944_v63 }
 0x2a1   : > { %2250 = vst.msk [vmem:[%s3782_s13 + $0x10] sm:$0xff] %vm2247_vm2, %v1939_v62  ;;  %v3023_v1 = vpop.f32.mrb[36].mxu0 }
 0x2a2   : > { %v1954_v53 = vadd.f32 %v3023_v1, %v3775_v54  ;;  %v1948_v2 = vpop.f32.mrb[37].mxu0 }
 0x2a3   : > { %v1949_v3 = vadd.f32 %v3775_v54, %v1948_v2 }
 0x2a4   : > { %2253 = vst.msk [vmem:[%s3782_s13 + $0x28] sm:$0xff] %vm2247_vm2, %v1954_v53 }
 0x2a5   : > { %2252 = vst.msk [vmem:[%s3782_s13 + $0x20] sm:$0xff] %vm2247_vm2, %v1949_v3  ;;  %v3026_v8 = vpop.f32.mrb[38].mxu0 }
 0x2a6   : > { %v1964_v61 = vadd.f32 %v3026_v8, %v3775_v54  ;;  %v1958_v6 = vpop.f32.mrb[39].mxu0 }
 0x2a7   : > { %v1959_v9 = vadd.f32 %v3775_v54, %v1958_v6 }
 0x2a8   : > { %2255 = vst.msk [vmem:[%s3782_s13 + $0x38] sm:$0xff] %vm2247_vm2, %v1964_v61 }
 0x2a9   : > { %2254 = vst.msk [vmem:[%s3782_s13 + $0x30] sm:$0xff] %vm2247_vm2, %v1959_v9  ;;  %v3029_v10 = vpop.f32.mrb[40].mxu0 }
 0x2aa   : > { %v1974_v5 = vadd.f32 %v3029_v10, %v3775_v54  ;;  %v1968_v14 = vpop.f32.mrb[41].mxu0 }
 0x2ab   : > { %v1969_v11 = vadd.f32 %v3775_v54, %v1968_v14 }
 0x2ac   : > { %2257 = vst.msk [vmem:[%s3782_s13 + $0x48] sm:$0xff] %vm2247_vm2, %v1974_v5 }
 0x2ad   : > { %2256 = vst.msk [vmem:[%s3782_s13 + $0x40] sm:$0xff] %vm2247_vm2, %v1969_v11  ;;  %v3032_v12 = vpop.f32.mrb[42].mxu0 }
 0x2ae   : > { %v1984_v13 = vadd.f32 %v3032_v12, %v3775_v54  ;;  %v1978_v23 = vpop.f32.mrb[43].mxu0 }
 0x2af   : > { %v1979_v15 = vadd.f32 %v3775_v54, %v1978_v23 }
 0x2b0   : > { %2259 = vst.msk [vmem:[%s3782_s13 + $0x58] sm:$0xff] %vm2247_vm2, %v1984_v13 }
 0x2b1   : > { %2258 = vst.msk [vmem:[%s3782_s13 + $0x50] sm:$0xff] %vm2247_vm2, %v1979_v15  ;;  %v3035_v19 = vpop.f32.mrb[44].mxu0 }
 0x2b2   : > { %v1994_v22 = vadd.f32 %v3035_v19, %v3775_v54  ;;  %v1988_v31 = vpop.f32.mrb[45].mxu0 }
 0x2b3   : > { %v1989_v20 = vadd.f32 %v3775_v54, %v1988_v31 }
 0x2b4   : > { %2261 = vst.msk [vmem:[%s3782_s13 + $0x68] sm:$0xff] %vm2247_vm2, %v1994_v22 }
 0x2b5   : > { %2260 = vst.msk [vmem:[%s3782_s13 + $0x60] sm:$0xff] %vm2247_vm2, %v1989_v20  ;;  %v3038_v21 = vpop.f32.mrb[46].mxu0 }
 0x2b6   : > { %v2004_v30 = vadd.f32 %v3038_v21, %v3775_v54  ;;  %v1998_v39 = vpop.f32.mrb[47].mxu0 }
 0x2b7   : > { %v1999_v24 = vadd.f32 %v3775_v54, %v1998_v39 }
 0x2b8   : > { %2263 = vst.msk [vmem:[%s3782_s13 + $0x78] sm:$0xff] %vm2247_vm2, %v2004_v30 }
 0x2b9   : > { %2262 = vst.msk [vmem:[%s3782_s13 + $0x70] sm:$0xff] %vm2247_vm2, %v1999_v24  ;;  %v3041_v25 = vpop.f32.mrb[48].mxu0 }
 0x2ba   : > { %v2014_v38 = vadd.f32 %v3041_v25, %v3775_v54  ;;  %v2008_v49 = vpop.f32.mrb[49].mxu0 }
 0x2bb   : > { %v2009_v26 = vadd.f32 %v3775_v54, %v2008_v49 }
 0x2bc   : > { %2265 = vst.msk [vmem:[%s3782_s13 + $0x88] sm:$0xff] %vm2247_vm2, %v2014_v38 }
 0x2bd   : > { %2264 = vst.msk [vmem:[%s3782_s13 + $0x80] sm:$0xff] %vm2247_vm2, %v2009_v26  ;;  %v3044_v29 = vpop.f32.mrb[50].mxu0 }
 0x2be   : > { %v2024_v48 = vadd.f32 %v3044_v29, %v3775_v54  ;;  %v2018_v59 = vpop.f32.mrb[51].mxu0 }
 0x2bf   : > { %v2019_v32 = vadd.f32 %v3775_v54, %v2018_v59 }
 0x2c0   : > { %2267 = vst.msk [vmem:[%s3782_s13 + $0x98] sm:$0xff] %vm2247_vm2, %v2024_v48 }
 0x2c1   : > { %2266 = vst.msk [vmem:[%s3782_s13 + $0x90] sm:$0xff] %vm2247_vm2, %v2019_v32  ;;  %v3047_v33 = vpop.f32.mrb[52].mxu0 }
 0x2c2   : > { %v2034_v58 = vadd.f32 %v3047_v33, %v3775_v54  ;;  %v2028_v7 = vpop.f32.mrb[53].mxu0 }
 0x2c3   : > { %v2029_v34 = vadd.f32 %v3775_v54, %v2028_v7 }
 0x2c4   : > { %2269 = vst.msk [vmem:[%s3782_s13 + $0xa8] sm:$0xff] %vm2247_vm2, %v2034_v58 }
 0x2c5   : > { %2268 = vst.msk [vmem:[%s3782_s13 + $0xa0] sm:$0xff] %vm2247_vm2, %v2029_v34  ;;  %v3050_v35 = vpop.f32.mrb[54].mxu0 }
 0x2c6   : > { %v2044_v4 = vadd.f32 %v3050_v35, %v3775_v54  ;;  %v2038_v18 = vpop.f32.mrb[55].mxu0 }
 0x2c7   : > { %v2039_v36 = vadd.f32 %v3775_v54, %v2038_v18 }
 0x2c8   : > { %2271 = vst.msk [vmem:[%s3782_s13 + $0xb8] sm:$0xff] %vm2247_vm2, %v2044_v4 }
 0x2c9   : > { %2270 = vst.msk [vmem:[%s3782_s13 + $0xb0] sm:$0xff] %vm2247_vm2, %v2039_v36  ;;  %v3053_v37 = vpop.f32.mrb[56].mxu0 }
 0x2ca   : > { %v2054_v17 = vadd.f32 %v3053_v37, %v3775_v54  ;;  %v2048_v28 = vpop.f32.mrb[57].mxu0 }
 0x2cb   : > { %v2049_v42 = vadd.f32 %v3775_v54, %v2048_v28 }
 0x2cc   : > { %2273 = vst.msk [vmem:[%s3782_s13 + $0xc8] sm:$0xff] %vm2247_vm2, %v2054_v17 }
 0x2cd   : > { %2272 = vst.msk [vmem:[%s3782_s13 + $0xc0] sm:$0xff] %vm2247_vm2, %v2049_v42  ;;  %v3056_v43 = vpop.f32.mrb[58].mxu0 }
 0x2ce   : > { %v2064_v27 = vadd.f32 %v3056_v43, %v3775_v54  ;;  %v2058_v41 = vpop.f32.mrb[59].mxu0 }
 0x2cf   : > { %v2059_v46 = vadd.f32 %v3775_v54, %v2058_v41 }
 0x2d0   : > { %2275 = vst.msk [vmem:[%s3782_s13 + $0xd8] sm:$0xff] %vm2247_vm2, %v2064_v27 }
 0x2d1   : > { %2274 = vst.msk [vmem:[%s3782_s13 + $0xd0] sm:$0xff] %vm2247_vm2, %v2059_v46  ;;  %v3059_v45 = vpop.f32.mrb[60].mxu0 }
 0x2d2   : > { %v2074_v47 = vadd.f32 %v3059_v45, %v3775_v54  ;;  %v2068_v40 = vpop.f32.mrb[61].mxu0 }
 0x2d3   : > { %v2069_v51 = vadd.f32 %v3775_v54, %v2068_v40 }
 0x2d4   : > { %2277 = vst.msk [vmem:[%s3782_s13 + $0xe8] sm:$0xff] %vm2247_vm2, %v2074_v47 }
 0x2d5   : > { %2276 = vst.msk [vmem:[%s3782_s13 + $0xe0] sm:$0xff] %vm2247_vm2, %v2069_v51  ;;  %v3062_v52 = vpop.f32.mrb[62].mxu0 }
 0x2d6   : > { %v2084_v55 = vadd.f32 %v3062_v52, %v3775_v54  ;;  %v2078_v56 = vpop.f32.mrb[63].mxu0 }
 0x2d7   : > { %v2079_v50 = vadd.f32 %v3775_v54, %v2078_v56 }
 0x2d8   : > { %2279 = vst.msk [vmem:[%s3782_s13 + $0xf8] sm:$0xff] %vm2247_vm2, %v2084_v55 }
 0x2d9   : > { %2278 = vst.msk [vmem:[%s3782_s13 + $0xf0] sm:$0xff] %vm2247_vm2, %v2079_v50  ;;  %v3065_v44 = vpop.f32.mrb[64].mxu0 }
 0x2da   : > { %v2094_v16 = vadd.f32 %v3065_v44, %v3775_v54  ;;  %v2088_v57 = vpop.f32.mrb[65].mxu0 }
 0x2db   : > { %v2089_v60 = vadd.f32 %v3775_v54, %v2088_v57 }
 0x2dc   : > { %2281 = vst.msk [vmem:[%s3782_s13 + $0x108] sm:$0xff] %vm2247_vm2, %v2094_v16 }
 0x2dd   : > { %2280 = vst.msk [vmem:[%s3782_s13 + $0x100] sm:$0xff] %vm2247_vm2, %v2089_v60  ;;  %v3068_v63 = vpop.f32.mrb[66].mxu0 }
 0x2de   : > { %v2104_v0 = vadd.f32 %v3068_v63, %v3775_v54  ;;  %v2098_v62 = vpop.f32.mrb[67].mxu0 }
 0x2df   : > { %v2099_v1 = vadd.f32 %v3775_v54, %v2098_v62 }
 0x2e0   : > { %2283 = vst.msk [vmem:[%s3782_s13 + $0x118] sm:$0xff] %vm2247_vm2, %v2104_v0 }
 0x2e1   : > { %2282 = vst.msk [vmem:[%s3782_s13 + $0x110] sm:$0xff] %vm2247_vm2, %v2099_v1  ;;  %v3071_v53 = vpop.f32.mrb[68].mxu0 }
 0x2e2   : > { %v2114_v2 = vadd.f32 %v3071_v53, %v3775_v54  ;;  %v2108_v3 = vpop.f32.mrb[69].mxu0 }
 0x2e3   : > { %v2109_v8 = vadd.f32 %v3775_v54, %v2108_v3 }
 0x2e4   : > { %2285 = vst.msk [vmem:[%s3782_s13 + $0x128] sm:$0xff] %vm2247_vm2, %v2114_v2 }
 0x2e5   : > { %2284 = vst.msk [vmem:[%s3782_s13 + $0x120] sm:$0xff] %vm2247_vm2, %v2109_v8  ;;  %v3074_v61 = vpop.f32.mrb[70].mxu0 }
 0x2e6   : > { %v2124_v6 = vadd.f32 %v3074_v61, %v3775_v54  ;;  %v2118_v9 = vpop.f32.mrb[71].mxu0 }
 0x2e7   : > { %v2119_v10 = vadd.f32 %v3775_v54, %v2118_v9 }
 0x2e8   : > { %2287 = vst.msk [vmem:[%s3782_s13 + $0x138] sm:$0xff] %vm2247_vm2, %v2124_v6 }
 0x2e9   : > { %2286 = vst.msk [vmem:[%s3782_s13 + $0x130] sm:$0xff] %vm2247_vm2, %v2119_v10  ;;  %v3077_v5 = vpop.f32.mrb[72].mxu0 }
 0x2ea   : > { %v2134_v14 = vadd.f32 %v3077_v5, %v3775_v54  ;;  %v2128_v11 = vpop.f32.mrb[73].mxu0 }
 0x2eb   : > { %v2129_v12 = vadd.f32 %v3775_v54, %v2128_v11 }
 0x2ec   : > { %2289 = vst.msk [vmem:[%s3782_s13 + $0x148] sm:$0xff] %vm2247_vm2, %v2134_v14 }
 0x2ed   : > { %2288 = vst.msk [vmem:[%s3782_s13 + $0x140] sm:$0xff] %vm2247_vm2, %v2129_v12  ;;  %v3080_v13 = vpop.f32.mrb[74].mxu0 }
 0x2ee   : > { %v2144_v23 = vadd.f32 %v3080_v13, %v3775_v54  ;;  %v2138_v15 = vpop.f32.mrb[75].mxu0 }
 0x2ef   : > { %v2139_v19 = vadd.f32 %v3775_v54, %v2138_v15 }
 0x2f0   : > { %2291 = vst.msk [vmem:[%s3782_s13 + $0x158] sm:$0xff] %vm2247_vm2, %v2144_v23 }
 0x2f1   : > { %2290 = vst.msk [vmem:[%s3782_s13 + $0x150] sm:$0xff] %vm2247_vm2, %v2139_v19  ;;  %v3083_v22 = vpop.f32.mrb[76].mxu0 }
 0x2f2   : > { %v2154_v31 = vadd.f32 %v3083_v22, %v3775_v54  ;;  %v2148_v20 = vpop.f32.mrb[77].mxu0 }
 0x2f3   : > { %v2149_v21 = vadd.f32 %v3775_v54, %v2148_v20 }
 0x2f4   : > { %2293 = vst.msk [vmem:[%s3782_s13 + $0x168] sm:$0xff] %vm2247_vm2, %v2154_v31 }
 0x2f5   : > { %2292 = vst.msk [vmem:[%s3782_s13 + $0x160] sm:$0xff] %vm2247_vm2, %v2149_v21  ;;  %v3086_v30 = vpop.f32.mrb[78].mxu0 }
 0x2f6   : > { %v2164_v39 = vadd.f32 %v3086_v30, %v3775_v54  ;;  %v2158_v24 = vpop.f32.mrb[79].mxu0 }
 0x2f7   : > { %v2159_v25 = vadd.f32 %v3775_v54, %v2158_v24 }
 0x2f8   : > { %2295 = vst.msk [vmem:[%s3782_s13 + $0x178] sm:$0xff] %vm2247_vm2, %v2164_v39 }
 0x2f9   : > { %2294 = vst.msk [vmem:[%s3782_s13 + $0x170] sm:$0xff] %vm2247_vm2, %v2159_v25  ;;  %v3089_v38 = vpop.f32.mrb[80].mxu0 }
 0x2fa   : > { %v2174_v49 = vadd.f32 %v3089_v38, %v3775_v54  ;;  %v2168_v26 = vpop.f32.mrb[81].mxu0 }
 0x2fb   : > { %v2169_v29 = vadd.f32 %v3775_v54, %v2168_v26 }
 0x2fc   : > { %2297 = vst.msk [vmem:[%s3782_s13 + $0x188] sm:$0xff] %vm2247_vm2, %v2174_v49 }
 0x2fd   : > { %2296 = vst.msk [vmem:[%s3782_s13 + $0x180] sm:$0xff] %vm2247_vm2, %v2169_v29  ;;  %v3092_v48 = vpop.f32.mrb[82].mxu0 }
 0x2fe   : > { %v2184_v59 = vadd.f32 %v3092_v48, %v3775_v54  ;;  %v2178_v32 = vpop.f32.mrb[83].mxu0 }
 0x2ff   : > { %v2179_v33 = vadd.f32 %v3775_v54, %v2178_v32 }
 0x300   : > { %2299 = vst.msk [vmem:[%s3782_s13 + $0x198] sm:$0xff] %vm2247_vm2, %v2184_v59 }
 0x301   : > { %2298 = vst.msk [vmem:[%s3782_s13 + $0x190] sm:$0xff] %vm2247_vm2, %v2179_v33  ;;  %v3095_v58 = vpop.f32.mrb[84].mxu0 }
 0x302   : > { %v2194_v7 = vadd.f32 %v3095_v58, %v3775_v54  ;;  %v2188_v34 = vpop.f32.mrb[85].mxu0 }
 0x303   : > { %v2189_v35 = vadd.f32 %v3775_v54, %v2188_v34 }
 0x304   : > { %2301 = vst.msk [vmem:[%s3782_s13 + $0x1a8] sm:$0xff] %vm2247_vm2, %v2194_v7 }
 0x305   : > { %2300 = vst.msk [vmem:[%s3782_s13 + $0x1a0] sm:$0xff] %vm2247_vm2, %v2189_v35  ;;  %v3098_v4 = vpop.f32.mrb[86].mxu0 }
 0x306   : > { %v2204_v18 = vadd.f32 %v3098_v4, %v3775_v54  ;;  %v2198_v36 = vpop.f32.mrb[87].mxu0 }
 0x307   : > { %v2199_v37 = vadd.f32 %v3775_v54, %v2198_v36 }
 0x308   : > { %2303 = vst.msk [vmem:[%s3782_s13 + $0x1b8] sm:$0xff] %vm2247_vm2, %v2204_v18 }
 0x309   : > { %2302 = vst.msk [vmem:[%s3782_s13 + $0x1b0] sm:$0xff] %vm2247_vm2, %v2199_v37  ;;  %v3101_v17 = vpop.f32.mrb[88].mxu0 }
 0x30a   : > { %v2214_v28 = vadd.f32 %v3101_v17, %v3775_v54  ;;  %v2208_v42 = vpop.f32.mrb[89].mxu0 }
 0x30b   : > { %v2209_v43 = vadd.f32 %v3775_v54, %v2208_v42 }
 0x30c   : > { %2305 = vst.msk [vmem:[%s3782_s13 + $0x1c8] sm:$0xff] %vm2247_vm2, %v2214_v28 }
 0x30d   : > { %2304 = vst.msk [vmem:[%s3782_s13 + $0x1c0] sm:$0xff] %vm2247_vm2, %v2209_v43  ;;  %v3104_v27 = vpop.f32.mrb[90].mxu0 }
 0x30e   : > { %v2224_v41 = vadd.f32 %v3104_v27, %v3775_v54  ;;  %v2218_v46 = vpop.f32.mrb[91].mxu0 }
 0x30f   : > { %v2219_v45 = vadd.f32 %v3775_v54, %v2218_v46 }
 0x310   : > { %2307 = vst.msk [vmem:[%s3782_s13 + $0x1d8] sm:$0xff] %vm2247_vm2, %v2224_v41 }
 0x311   : > { %2306 = vst.msk [vmem:[%s3782_s13 + $0x1d0] sm:$0xff] %vm2247_vm2, %v2219_v45  ;;  %v3107_v47 = vpop.f32.mrb[92].mxu0 }
 0x312   : > { %v2234_v40 = vadd.f32 %v3107_v47, %v3775_v54  ;;  %v2228_v51 = vpop.f32.mrb[93].mxu0 }
 0x313   : > { %v2229_v52 = vadd.f32 %v3775_v54, %v2228_v51 }
 0x314   : > { %2309 = vst.msk [vmem:[%s3782_s13 + $0x1e8] sm:$0xff] %vm2247_vm2, %v2234_v40 }
 0x315   : > { %2308 = vst.msk [vmem:[%s3782_s13 + $0x1e0] sm:$0xff] %vm2247_vm2, %v2229_v52  ;;  %v3110_v55 = vpop.f32.mrb[94].mxu0 }
 0x316   : > { %v2244_v56 = vadd.f32 %v3110_v55, %v3775_v54  ;;  %v2238_v50 = vpop.f32.mrb[95].mxu0 }
 0x317   : > { %v2239_v44 = vadd.f32 %v3775_v54, %v2238_v50 }
 0x318   : > { %2311 = vst.msk [vmem:[%s3782_s13 + $0x1f8] sm:$0xff] %vm2247_vm2, %v2244_v56 }
 0x319   : > { %2310 = vst.msk [vmem:[%s3782_s13 + $0x1f0] sm:$0xff] %vm2247_vm2, %v2239_v44 }
 0x31a PF: > { %s17_s24 = sadd.s32 1, %s3165_s24  }
 0x31b   : > { %p14_p4 = scmp.ge.s32.totalorder %s17_s24, 4  }
 0x31d   :  { %16 = sbr.rel (!%p14_p4) target bundleno = 1 (0x1), region = 78 }

</bundles_post_ra>
